<compile_context>
chip_gen: v7x
topology: tpu7x:2x2x1
jax: 0.10.0
libtpu: 0.0.40
codegen_flags: <defaults>
</compile_context>

<pallas_src>
import math

import jax
import jax.numpy as jnp
from jax.experimental import pallas as pl
from jax.experimental.pallas import tpu as pltpu

EMBED_DIM = 256
NUM_HEADS = 4
HEAD_DIM = EMBED_DIM // NUM_HEADS


def mhsa_kernel(x_ref, wqkv_ref, bqkv_ref, wo_ref, bo_ref, o_ref):
    """One grid step = one batch tile of `bt` batch elements. QKV projection,
    per-head softmax attention and the output projection are all done on-chip."""
    bt, s, e = x_ref.shape
    m = bt * s

    # Flatten the batch tile so the projection matmuls have M = bt*S rows.
    x2 = x_ref[...].reshape(m, e).astype(jnp.bfloat16)

    # Fused QKV projection: one (M, E) @ (E, 3E) MXU pass with f32 accumulation.
    # The 1/8 attention scale is already folded into the Q columns/bias.
    qkv = jnp.dot(x2, wqkv_ref[...], preferred_element_type=jnp.float32)
    qkv = qkv + bqkv_ref[...]

    q = qkv[:, 0 * e:1 * e].reshape(bt, s, e).astype(jnp.bfloat16)
    k = qkv[:, 1 * e:2 * e].reshape(bt, s, e).astype(jnp.bfloat16)
    v = qkv[:, 2 * e:3 * e].reshape(bt, s, e).astype(jnp.bfloat16)

    # Per-head attention. Head outputs are collected and lane-concatenated so
    # the output projection runs once at full contraction depth (K = 256).
    # NOTE: full (bt, S, S) scores are materialized (6*bt*S^2 bytes per head
    # pass); for S >~ 1k on v5e/v6e, and ~2x earlier on v7x (64 MiB VMEM),
    # switch to a KV-tiled online-softmax inner loop.
    head_outs = []
    for h in range(NUM_HEADS):
        lo = h * HEAD_DIM
        hi = lo + HEAD_DIM
        # TODO(synk): head slices start at lane offsets 0/64/128/192; the 64
        # and 192 ones are not 128-lane aligned — check the Mosaic dump for
        # per-head relayout copies before restructuring head selection.
        qh = q[:, :, lo:hi]                       # (bt, S, Dh) bf16
        kh = k[:, :, lo:hi]
        vh = v[:, :, lo:hi]

        # Contract on the last axis of both operands: the K "transpose" is
        # absorbed into the MXU instead of an explicit XLU transpose. No
        # `* scale` here — it lives in Wq / bq.
        sc = jnp.einsum("bqd,bkd->bqk", qh, kh,
                        preferred_element_type=jnp.float32)
        sc = sc - jnp.max(sc, axis=-1, keepdims=True)
        p = jnp.exp(sc)                           # f32 exp (EUP) — v5e-safe
        # Deferred normalization: reciprocal of the row sums (EUP slot),
        # applied to the (bt, S, Dh) head output instead of the (bt, S, S)
        # probability matrix (~S/Dh fewer VPU multiplies).
        r = pl.reciprocal(jnp.sum(p, axis=-1, keepdims=True), approx=True)

        oh = jnp.einsum("bqk,bkd->bqd", p.astype(jnp.bfloat16), vh,
                        preferred_element_type=jnp.float32)   # (bt, S, Dh)
        head_outs.append(oh * r)

    # Lane-concatenate the heads in-register, then one full-depth output
    # projection: (M, 256) @ (256, 256). Output stores stay lane-dense (256).
    attn = jnp.concatenate(head_outs, axis=-1).reshape(m, e).astype(jnp.bfloat16)
    out = jnp.dot(attn, wo_ref[...], preferred_element_type=jnp.float32)
    out = out + bo_ref[...]
    o_ref[...] = out.reshape(bt, s, e).astype(o_ref.dtype)


def _pick_batch_tile(B, S, max_rows=2048, max_score_bytes=24 * 1024 * 1024):
    """Largest divisor bt of B such that the per-step row count and the
    materialized f32+bf16 score buffers stay within budget, preferring to keep
    at least 2 grid steps (megacore / 2-TC chips) when B allows it."""
    def fits(d):
        return d * S <= max_rows and 6 * d * S * S <= max_score_bytes

    divisors = [d for d in range(1, B + 1) if B % d == 0 and fits(d)]
    if not divisors:
        return 1
    multi = [d for d in divisors if B // d >= 2]
    return max(multi) if multi else max(divisors)


def multi_head_self_attention(x, params, *, batch_tile=None):
    """x: (B, S, E) float32. params: dict of (in,out) weights and (1, E) biases."""
    B, S, E = x.shape
    assert E == EMBED_DIM
    # Reshapes inside the kernel assume S is a multiple of the sublane tile
    # (8 for f32, 16 for bf16); other S stays correct but inserts relayouts.
    bt = batch_tile if batch_tile is not None else _pick_batch_tile(B, S)
    assert B % bt == 0
    grid = (B // bt,)

    # Fuse QKV weights/biases once on the host, folding the exact 1/8 softmax
    # scale into the Q third (power of two -> bit-neutral). Cast MXU operands
    # to bf16; the kernel accumulates in f32 and keeps softmax math in f32.
    scale = 1.0 / math.sqrt(HEAD_DIM)             # == 0.125 exactly
    wqkv = jnp.concatenate(
        [params["wq"] * scale, params["wk"], params["wv"]],
        axis=1).astype(jnp.bfloat16)
    bqkv = jnp.concatenate(
        [params["bq"] * scale, params["bk"], params["bv"]],
        axis=1).astype(jnp.float32)
    wo = params["wo"].astype(jnp.bfloat16)
    bo = params["bo"].astype(jnp.float32)

    # NOTE: the constant-index weight blocks could be single-buffered
    # (pipeline_mode=pl.Buffered(1)) to reclaim ~0.5 MiB of VMEM on v7x.
    return pl.pallas_call(
        mhsa_kernel,
        out_shape=jax.ShapeDtypeStruct((B, S, E), x.dtype),
        grid_spec=pltpu.PrefetchScalarGridSpec(
            num_scalar_prefetch=0,
            grid=grid,
            in_specs=[
                pl.BlockSpec((bt, S, E), lambda b: (b, 0, 0)),   # x tile
                pl.BlockSpec((E, 3 * E), lambda b: (0, 0)),      # Wqkv (fused, scaled)
                pl.BlockSpec((1, 3 * E), lambda b: (0, 0)),      # bqkv (fused, scaled)
                pl.BlockSpec((E, E), lambda b: (0, 0)),          # Wo
                pl.BlockSpec((1, E), lambda b: (0, 0)),          # bo
            ],
            out_specs=pl.BlockSpec((bt, S, E), lambda b: (b, 0, 0)),
        ),
        compiler_params=pltpu.CompilerParams(
            dimension_semantics=("parallel",),
            # 64 MiB fits v5e/v6e comfortably; on v7x (64 MiB physical per TC)
            # the score-bytes cap in _pick_batch_tile keeps usage well below it.
            vmem_limit_bytes=64 * 1024 * 1024,
        ),
    )(x, wqkv, bqkv, wo, bo)


def reference_mhsa(x, params):
    """Pure-JAX f32 reference reproducing the PyTorch forward exactly."""
    B, S, E = x.shape
    H, Dh = NUM_HEADS, HEAD_DIM

    def lin(t, w, b):
        return t @ w + b  # w is (in, out), b is (1, E)

    q = lin(x, params["wq"], params["bq"]).reshape(B, S, H, Dh).transpose(0, 2, 1, 3)
    k = lin(x, params["wk"], params["bk"]).reshape(B, S, H, Dh).transpose(0, 2, 1, 3)
    v = lin(x, params["wv"], params["bv"]).reshape(B, S, H, Dh).transpose(0, 2, 1, 3)
    scores = jnp.einsum("bhqd,bhkd->bhqk", q, k) / jnp.sqrt(jnp.float32(Dh))
    attn = jax.nn.softmax(scores, axis=-1)
    out = jnp.einsum("bhqk,bhkd->bhqd", attn, v)
    out = out.transpose(0, 2, 1, 3).reshape(B, S, E)
    return lin(out, params["wo"], params["bo"])


def init_params(key):
    """Deterministic parameter init; weights stored as (in, out), biases as (1, E)."""
    keys = jax.random.split(key, 8)
    bound = 1.0 / math.sqrt(EMBED_DIM)

    def w(k):
        return jax.random.uniform(k, (EMBED_DIM, EMBED_DIM), jnp.float32, -bound, bound)

    def b(k):
        return jax.random.uniform(k, (1, EMBED_DIM), jnp.float32, -bound, bound)

    return {
        "wq": w(keys[0]), "bq": b(keys[1]),
        "wk": w(keys[2]), "bk": b(keys[3]),
        "wv": w(keys[4]), "bv": b(keys[5]),
        "wo": w(keys[6]), "bo": b(keys[7]),
    }


if __name__ == "__main__":
    key = jax.random.PRNGKey(0)
    k_x, k_p = jax.random.split(key)

    B, S = 2, 8
    x = jax.random.normal(k_x, (B, S, EMBED_DIM), jnp.float32)
    params = init_params(k_p)

    out = multi_head_self_attention(x, params)
    out = jax.block_until_ready(out)

    ref = reference_mhsa(x, params)
    assert out.shape == (B, S, EMBED_DIM)
    # bf16 MXU operands (f32 accumulation) + approx reciprocal -> loosen
    # tolerance vs the f32 reference.
    assert jnp.allclose(out, ref, atol=3e-2, rtol=3e-2), "mismatch vs reference"

    print("KERNEL_OK")
</pallas_src>

<mosaic_0001>
module attributes {stable_mosaic.version = 11 : i64} {
  func.func @mhsa_kernel(%arg0: i32, %arg1: memref<1x8x256xf32, #tpu.memory_space<vmem>>, %arg2: memref<256x768xbf16, #tpu.memory_space<vmem>>, %arg3: memref<1x768xf32, #tpu.memory_space<vmem>>, %arg4: memref<256x256xbf16, #tpu.memory_space<vmem>>, %arg5: memref<1x256xf32, #tpu.memory_space<vmem>>, %arg6: memref<1x8x256xf32, #tpu.memory_space<vmem>>) attributes {dimension_semantics = [#tpu.dimension_semantics<parallel>], iteration_bounds = array<i64: 2>, scalar_prefetch = 0 : i64, scratch_operands = 0 : i64, tpu.core_type = #tpu.core_type<tc>, window_params = [{transform_indices = @transform_0, window_bounds = array<i64: 1, 8, 256>}, {pipeline_mode = #tpu.pipeline_mode<synchronous>, transform_indices = @transform_1, window_bounds = array<i64: 256, 768>}, {pipeline_mode = #tpu.pipeline_mode<synchronous>, transform_indices = @transform_2, window_bounds = array<i64: 1, 768>}, {pipeline_mode = #tpu.pipeline_mode<synchronous>, transform_indices = @transform_3, window_bounds = array<i64: 256, 256>}, {pipeline_mode = #tpu.pipeline_mode<synchronous>, transform_indices = @transform_4, window_bounds = array<i64: 1, 256>}, {transform_indices = @transform_5, window_bounds = array<i64: 1, 8, 256>}]} {
    %c0 = arith.constant 0 : index
    %c0_0 = arith.constant 0 : index
    %c0_1 = arith.constant 0 : index
    %0 = vector.load %arg1[%c0, %c0_0, %c0_1] : memref<1x8x256xf32, #tpu.memory_space<vmem>>, vector<1x8x256xf32>
    %1 = vector.shape_cast %0 : vector<1x8x256xf32> to vector<8x256xf32>
    %2 = arith.truncf %1 : vector<8x256xf32> to vector<8x256xbf16>
    %c0_2 = arith.constant 0 : index
    %c0_3 = arith.constant 0 : index
    %3 = vector.load %arg2[%c0_2, %c0_3] : memref<256x768xbf16, #tpu.memory_space<vmem>>, vector<256x768xbf16>
    %cst = arith.constant dense<0.000000e+00> : vector<8x768xf32>
    %4 = tpu.matmul %2, %3, %cst {dimension_numbers = #tpu.dot_dimension_numbers<[1], [0], [0], [1], [0, 0, 1, 1], [], []>} : vector<8x256xbf16>, vector<256x768xbf16>, vector<8x768xf32> -> vector<8x768xf32>
    %c0_4 = arith.constant 0 : index
    %c0_5 = arith.constant 0 : index
    %5 = vector.load %arg3[%c0_4, %c0_5] : memref<1x768xf32, #tpu.memory_space<vmem>>, vector<1x768xf32>
    %6 = vector.broadcast %5 : vector<1x768xf32> to vector<8x768xf32>
    %7 = arith.addf %4, %6 : vector<8x768xf32>
    %8 = vector.extract_strided_slice %7 {offsets = [0, 0], sizes = [8, 256], strides = [1, 1]} : vector<8x768xf32> to vector<8x256xf32>
    %9 = vector.shape_cast %8 : vector<8x256xf32> to vector<1x8x256xf32>
    %10 = arith.truncf %9 : vector<1x8x256xf32> to vector<1x8x256xbf16>
    %11 = vector.extract_strided_slice %7 {offsets = [0, 256], sizes = [8, 256], strides = [1, 1]} : vector<8x768xf32> to vector<8x256xf32>
    %12 = vector.shape_cast %11 : vector<8x256xf32> to vector<1x8x256xf32>
    %13 = arith.truncf %12 : vector<1x8x256xf32> to vector<1x8x256xbf16>
    %14 = vector.extract_strided_slice %7 {offsets = [0, 512], sizes = [8, 256], strides = [1, 1]} : vector<8x768xf32> to vector<8x256xf32>
    %15 = vector.shape_cast %14 : vector<8x256xf32> to vector<1x8x256xf32>
    %16 = arith.truncf %15 : vector<1x8x256xf32> to vector<1x8x256xbf16>
    %17 = vector.extract_strided_slice %10 {offsets = [0, 0, 0], sizes = [1, 8, 64], strides = [1, 1, 1]} : vector<1x8x256xbf16> to vector<1x8x64xbf16>
    %18 = vector.extract_strided_slice %13 {offsets = [0, 0, 0], sizes = [1, 8, 64], strides = [1, 1, 1]} : vector<1x8x256xbf16> to vector<1x8x64xbf16>
    %19 = vector.extract_strided_slice %16 {offsets = [0, 0, 0], sizes = [1, 8, 64], strides = [1, 1, 1]} : vector<1x8x256xbf16> to vector<1x8x64xbf16>
    "tpu.trace_start"() <{level = 10 : i32, message = "bqd,bkd->bqk"}> : () -> ()
    %cst_6 = arith.constant dense<0.000000e+00> : vector<1x8x8xf32>
    %20 = tpu.matmul %17, %18, %cst_6 {dimension_numbers = #tpu.dot_dimension_numbers<[2], [2], [1], [1], [0, 0, 0, 1, 1, 1], [0], [0]>} : vector<1x8x64xbf16>, vector<1x8x64xbf16>, vector<1x8x8xf32> -> vector<1x8x8xf32>
    "tpu.trace_stop"() : () -> ()
    %cst_7 = arith.constant dense<0xFF800000> : vector<1x8xf32>
    %21 = vector.multi_reduction <maximumf>, %20, %cst_7 [2] : vector<1x8x8xf32> to vector<1x8xf32>
    %22 = vector.shape_cast %21 : vector<1x8xf32> to vector<1x8x1xf32>
    %23 = vector.broadcast %22 : vector<1x8x1xf32> to vector<1x8x8xf32>
    %24 = arith.subf %20, %23 : vector<1x8x8xf32>
    %25 = math.exp %24 : vector<1x8x8xf32>
    %cst_8 = arith.constant dense<0.000000e+00> : vector<1x8xf32>
    %26 = vector.multi_reduction <add>, %25, %cst_8 [2] : vector<1x8x8xf32> to vector<1x8xf32>
    %27 = vector.shape_cast %26 : vector<1x8xf32> to vector<1x8x1xf32>
    %28 = tpu.reciprocal %27 {approx = true} : vector<1x8x1xf32> -> vector<1x8x1xf32>
    %29 = arith.truncf %25 : vector<1x8x8xf32> to vector<1x8x8xbf16>
    "tpu.trace_start"() <{level = 10 : i32, message = "bqk,bkd->bqd"}> : () -> ()
    %cst_9 = arith.constant dense<0.000000e+00> : vector<1x8x64xf32>
    %30 = tpu.matmul %29, %19, %cst_9 {dimension_numbers = #tpu.dot_dimension_numbers<[2], [1], [1], [2], [0, 0, 0, 1, 1, 2], [0], [0]>} : vector<1x8x8xbf16>, vector<1x8x64xbf16>, vector<1x8x64xf32> -> vector<1x8x64xf32>
    "tpu.trace_stop"() : () -> ()
    %31 = vector.broadcast %28 : vector<1x8x1xf32> to vector<1x8x64xf32>
    %32 = arith.mulf %30, %31 : vector<1x8x64xf32>
    %33 = vector.extract_strided_slice %10 {offsets = [0, 0, 64], sizes = [1, 8, 64], strides = [1, 1, 1]} : vector<1x8x256xbf16> to vector<1x8x64xbf16>
    %34 = vector.extract_strided_slice %13 {offsets = [0, 0, 64], sizes = [1, 8, 64], strides = [1, 1, 1]} : vector<1x8x256xbf16> to vector<1x8x64xbf16>
    %35 = vector.extract_strided_slice %16 {offsets = [0, 0, 64], sizes = [1, 8, 64], strides = [1, 1, 1]} : vector<1x8x256xbf16> to vector<1x8x64xbf16>
    "tpu.trace_start"() <{level = 10 : i32, message = "bqd,bkd->bqk"}> : () -> ()
    %cst_10 = arith.constant dense<0.000000e+00> : vector<1x8x8xf32>
    %36 = tpu.matmul %33, %34, %cst_10 {dimension_numbers = #tpu.dot_dimension_numbers<[2], [2], [1], [1], [0, 0, 0, 1, 1, 1], [0], [0]>} : vector<1x8x64xbf16>, vector<1x8x64xbf16>, vector<1x8x8xf32> -> vector<1x8x8xf32>
    "tpu.trace_stop"() : () -> ()
    %cst_11 = arith.constant dense<0xFF800000> : vector<1x8xf32>
    %37 = vector.multi_reduction <maximumf>, %36, %cst_11 [2] : vector<1x8x8xf32> to vector<1x8xf32>
    %38 = vector.shape_cast %37 : vector<1x8xf32> to vector<1x8x1xf32>
    %39 = vector.broadcast %38 : vector<1x8x1xf32> to vector<1x8x8xf32>
    %40 = arith.subf %36, %39 : vector<1x8x8xf32>
    %41 = math.exp %40 : vector<1x8x8xf32>
    %cst_12 = arith.constant dense<0.000000e+00> : vector<1x8xf32>
    %42 = vector.multi_reduction <add>, %41, %cst_12 [2] : vector<1x8x8xf32> to vector<1x8xf32>
    %43 = vector.shape_cast %42 : vector<1x8xf32> to vector<1x8x1xf32>
    %44 = tpu.reciprocal %43 {approx = true} : vector<1x8x1xf32> -> vector<1x8x1xf32>
    %45 = arith.truncf %41 : vector<1x8x8xf32> to vector<1x8x8xbf16>
    "tpu.trace_start"() <{level = 10 : i32, message = "bqk,bkd->bqd"}> : () -> ()
    %cst_13 = arith.constant dense<0.000000e+00> : vector<1x8x64xf32>
    %46 = tpu.matmul %45, %35, %cst_13 {dimension_numbers = #tpu.dot_dimension_numbers<[2], [1], [1], [2], [0, 0, 0, 1, 1, 2], [0], [0]>} : vector<1x8x8xbf16>, vector<1x8x64xbf16>, vector<1x8x64xf32> -> vector<1x8x64xf32>
    "tpu.trace_stop"() : () -> ()
    %47 = vector.broadcast %44 : vector<1x8x1xf32> to vector<1x8x64xf32>
    %48 = arith.mulf %46, %47 : vector<1x8x64xf32>
    %49 = vector.extract_strided_slice %10 {offsets = [0, 0, 128], sizes = [1, 8, 64], strides = [1, 1, 1]} : vector<1x8x256xbf16> to vector<1x8x64xbf16>
    %50 = vector.extract_strided_slice %13 {offsets = [0, 0, 128], sizes = [1, 8, 64], strides = [1, 1, 1]} : vector<1x8x256xbf16> to vector<1x8x64xbf16>
    %51 = vector.extract_strided_slice %16 {offsets = [0, 0, 128], sizes = [1, 8, 64], strides = [1, 1, 1]} : vector<1x8x256xbf16> to vector<1x8x64xbf16>
    "tpu.trace_start"() <{level = 10 : i32, message = "bqd,bkd->bqk"}> : () -> ()
    %cst_14 = arith.constant dense<0.000000e+00> : vector<1x8x8xf32>
    %52 = tpu.matmul %49, %50, %cst_14 {dimension_numbers = #tpu.dot_dimension_numbers<[2], [2], [1], [1], [0, 0, 0, 1, 1, 1], [0], [0]>} : vector<1x8x64xbf16>, vector<1x8x64xbf16>, vector<1x8x8xf32> -> vector<1x8x8xf32>
    "tpu.trace_stop"() : () -> ()
    %cst_15 = arith.constant dense<0xFF800000> : vector<1x8xf32>
    %53 = vector.multi_reduction <maximumf>, %52, %cst_15 [2] : vector<1x8x8xf32> to vector<1x8xf32>
    %54 = vector.shape_cast %53 : vector<1x8xf32> to vector<1x8x1xf32>
    %55 = vector.broadcast %54 : vector<1x8x1xf32> to vector<1x8x8xf32>
    %56 = arith.subf %52, %55 : vector<1x8x8xf32>
    %57 = math.exp %56 : vector<1x8x8xf32>
    %cst_16 = arith.constant dense<0.000000e+00> : vector<1x8xf32>
    %58 = vector.multi_reduction <add>, %57, %cst_16 [2] : vector<1x8x8xf32> to vector<1x8xf32>
    %59 = vector.shape_cast %58 : vector<1x8xf32> to vector<1x8x1xf32>
    %60 = tpu.reciprocal %59 {approx = true} : vector<1x8x1xf32> -> vector<1x8x1xf32>
    %61 = arith.truncf %57 : vector<1x8x8xf32> to vector<1x8x8xbf16>
    "tpu.trace_start"() <{level = 10 : i32, message = "bqk,bkd->bqd"}> : () -> ()
    %cst_17 = arith.constant dense<0.000000e+00> : vector<1x8x64xf32>
    %62 = tpu.matmul %61, %51, %cst_17 {dimension_numbers = #tpu.dot_dimension_numbers<[2], [1], [1], [2], [0, 0, 0, 1, 1, 2], [0], [0]>} : vector<1x8x8xbf16>, vector<1x8x64xbf16>, vector<1x8x64xf32> -> vector<1x8x64xf32>
    "tpu.trace_stop"() : () -> ()
    %63 = vector.broadcast %60 : vector<1x8x1xf32> to vector<1x8x64xf32>
    %64 = arith.mulf %62, %63 : vector<1x8x64xf32>
    %65 = vector.extract_strided_slice %10 {offsets = [0, 0, 192], sizes = [1, 8, 64], strides = [1, 1, 1]} : vector<1x8x256xbf16> to vector<1x8x64xbf16>
    %66 = vector.extract_strided_slice %13 {offsets = [0, 0, 192], sizes = [1, 8, 64], strides = [1, 1, 1]} : vector<1x8x256xbf16> to vector<1x8x64xbf16>
    %67 = vector.extract_strided_slice %16 {offsets = [0, 0, 192], sizes = [1, 8, 64], strides = [1, 1, 1]} : vector<1x8x256xbf16> to vector<1x8x64xbf16>
    "tpu.trace_start"() <{level = 10 : i32, message = "bqd,bkd->bqk"}> : () -> ()
    %cst_18 = arith.constant dense<0.000000e+00> : vector<1x8x8xf32>
    %68 = tpu.matmul %65, %66, %cst_18 {dimension_numbers = #tpu.dot_dimension_numbers<[2], [2], [1], [1], [0, 0, 0, 1, 1, 1], [0], [0]>} : vector<1x8x64xbf16>, vector<1x8x64xbf16>, vector<1x8x8xf32> -> vector<1x8x8xf32>
    "tpu.trace_stop"() : () -> ()
    %cst_19 = arith.constant dense<0xFF800000> : vector<1x8xf32>
    %69 = vector.multi_reduction <maximumf>, %68, %cst_19 [2] : vector<1x8x8xf32> to vector<1x8xf32>
    %70 = vector.shape_cast %69 : vector<1x8xf32> to vector<1x8x1xf32>
    %71 = vector.broadcast %70 : vector<1x8x1xf32> to vector<1x8x8xf32>
    %72 = arith.subf %68, %71 : vector<1x8x8xf32>
    %73 = math.exp %72 : vector<1x8x8xf32>
    %cst_20 = arith.constant dense<0.000000e+00> : vector<1x8xf32>
    %74 = vector.multi_reduction <add>, %73, %cst_20 [2] : vector<1x8x8xf32> to vector<1x8xf32>
    %75 = vector.shape_cast %74 : vector<1x8xf32> to vector<1x8x1xf32>
    %76 = tpu.reciprocal %75 {approx = true} : vector<1x8x1xf32> -> vector<1x8x1xf32>
    %77 = arith.truncf %73 : vector<1x8x8xf32> to vector<1x8x8xbf16>
    "tpu.trace_start"() <{level = 10 : i32, message = "bqk,bkd->bqd"}> : () -> ()
    %cst_21 = arith.constant dense<0.000000e+00> : vector<1x8x64xf32>
    %78 = tpu.matmul %77, %67, %cst_21 {dimension_numbers = #tpu.dot_dimension_numbers<[2], [1], [1], [2], [0, 0, 0, 1, 1, 2], [0], [0]>} : vector<1x8x8xbf16>, vector<1x8x64xbf16>, vector<1x8x64xf32> -> vector<1x8x64xf32>
    "tpu.trace_stop"() : () -> ()
    %79 = vector.broadcast %76 : vector<1x8x1xf32> to vector<1x8x64xf32>
    %80 = arith.mulf %78, %79 : vector<1x8x64xf32>
    %81 = tpu.concatenate %32, %48, %64, %80 in 2 : vector<1x8x64xf32>, vector<1x8x64xf32>, vector<1x8x64xf32>, vector<1x8x64xf32> -> vector<1x8x256xf32>
    %82 = vector.shape_cast %81 : vector<1x8x256xf32> to vector<8x256xf32>
    %83 = arith.truncf %82 : vector<8x256xf32> to vector<8x256xbf16>
    %c0_22 = arith.constant 0 : index
    %c0_23 = arith.constant 0 : index
    %84 = vector.load %arg4[%c0_22, %c0_23] : memref<256x256xbf16, #tpu.memory_space<vmem>>, vector<256x256xbf16>
    %cst_24 = arith.constant dense<0.000000e+00> : vector<8x256xf32>
    %85 = tpu.matmul %83, %84, %cst_24 {dimension_numbers = #tpu.dot_dimension_numbers<[1], [0], [0], [1], [0, 0, 1, 1], [], []>} : vector<8x256xbf16>, vector<256x256xbf16>, vector<8x256xf32> -> vector<8x256xf32>
    %c0_25 = arith.constant 0 : index
    %c0_26 = arith.constant 0 : index
    %86 = vector.load %arg5[%c0_25, %c0_26] : memref<1x256xf32, #tpu.memory_space<vmem>>, vector<1x256xf32>
    %87 = vector.broadcast %86 : vector<1x256xf32> to vector<8x256xf32>
    %88 = arith.addf %85, %87 : vector<8x256xf32>
    %89 = vector.shape_cast %88 : vector<8x256xf32> to vector<1x8x256xf32>
    %c0_27 = arith.constant 0 : index
    %c0_28 = arith.constant 0 : index
    %c0_29 = arith.constant 0 : index
    %90 = vector.load %arg6[%c0_27, %c0_28, %c0_29] : memref<1x8x256xf32, #tpu.memory_space<vmem>>, vector<1x8x256xf32>
    tpu.vector_store %arg6[%c0_27, %c0_28, %c0_29], %89 {strides = array<i32>} : memref<1x8x256xf32, #tpu.memory_space<vmem>>, vector<1x8x256xf32>,
    return
  }
  func.func @transform_0(%arg0: i32) -> (i32, i32, i32) {
    %c0_i32 = arith.constant 0 : i32
    %c0_i32_0 = arith.constant 0 : i32
    %c0_i32_1 = arith.constant 0 : i32
    return %arg0, %c0_i32, %c0_i32_0 : i32, i32, i32
  }
  func.func @transform_1(%arg0: i32) -> (i32, i32) {
    %c0_i32 = arith.constant 0 : i32
    %c0_i32_0 = arith.constant 0 : i32
    %c0_i32_1 = arith.constant 0 : i32
    return %c0_i32, %c0_i32_0 : i32, i32
  }
  func.func @transform_2(%arg0: i32) -> (i32, i32) {
    %c0_i32 = arith.constant 0 : i32
    %c0_i32_0 = arith.constant 0 : i32
    %c0_i32_1 = arith.constant 0 : i32
    return %c0_i32, %c0_i32_0 : i32, i32
  }
  func.func @transform_3(%arg0: i32) -> (i32, i32) {
    %c0_i32 = arith.constant 0 : i32
    %c0_i32_0 = arith.constant 0 : i32
    %c0_i32_1 = arith.constant 0 : i32
    return %c0_i32, %c0_i32_0 : i32, i32
  }
  func.func @transform_4(%arg0: i32) -> (i32, i32) {
    %c0_i32 = arith.constant 0 : i32
    %c0_i32_0 = arith.constant 0 : i32
    %c0_i32_1 = arith.constant 0 : i32
    return %c0_i32, %c0_i32_0 : i32, i32
  }
  func.func @transform_5(%arg0: i32) -> (i32, i32, i32) {
    %c0_i32 = arith.constant 0 : i32
    %c0_i32_0 = arith.constant 0 : i32
    %c0_i32_1 = arith.constant 0 : i32
    return %arg0, %c0_i32, %c0_i32_0 : i32, i32, i32
  }
}

</mosaic_0001>

<bundles_post_ra>
// kernel: tpu_custom_call.1
= control target key start
LH: loop header
LB: loop body
LE: loop exit
PB: predicated region body
PF: predicated region fallthrough
CT: control target
= control target key end

     0   :  { %10 = vsyncpa [#allocation3], 0  ;;  %s3038_s0 = inlined_call_operand.hbm [shape: f32[2,8,256], index: 0, kind: input, shape index: {}]   ;;  %s3039_s1 = inlined_call_operand.hbm [shape: bf16[256,768], index: 1, kind: input, shape index: {}]   ;;  %s3040_s2 = inlined_call_operand.hbm [shape: f32[1,768], index: 2, kind: input, shape index: {}]   ;;  %s3041_s3 = inlined_call_operand.hbm [shape: bf16[256,256], index: 3, kind: input, shape index: {}]   ;;  %s3042_s4 = inlined_call_operand.hbm [shape: f32[1,256], index: 4, kind: input, shape index: {}]   ;;  %s3043_s5 = inlined_call_operand.hbm [shape: f32[2,8,256], index: 5, kind: output, shape index: {}]  }
   0x1   :  { %12 = vsyncpa [#allocation3 + $0x1], 0 }
   0x2   :  { %13 = vsyncpa [#allocation6], 0 }
   0x3   :  { %14 = vsyncpa [#allocation9], 0 }
   0x4   :  { %15 = vsyncpa [#allocation4], 0 }
   0x5   :  { %17 = vsyncpa [#allocation4 + $0x1], 0  ;;  %s2648_s18 = smov 0   ;;  %s2650_s19 = smov 0  }
   0x6   :  { %s2652_s20 = smov 0   ;;  %s2654_s21 = smov 0  }
   0x7 LB: > { %s2605_s22 = smov [#allocation5]   ;;  %s2669_s24 = sadd.s32 4294967295, %s2603_s21   ;;  %s2603_s21 = sphi %s2654_s21, %s3067_s21   ;;  %s2599_s20 = sphi %s2652_s20, %s3066_s20   ;;  %s2595_s19 = sphi %s2650_s19, %s3065_s19   ;;  %s2591_s18 = sphi %s2648_s18, %s3064_s18  }
   0x8   : > { %s176_s23 = sshll.u32 %s2605_s22, 4  ;;  %p1857_p0 = scmp.ge.s32.totalorder %s2603_s21, 1  ;;  %s2674_s23 = int_to_ptr.vmem [resolvable:$true] %s176_s23 }
   0x9   : > { %p3044_p1 = scmp.eq.s32.totalorder %s2669_s24, 0  ;;  %p164_p2 = scmp.lt.s32.totalorder %s2603_s21, 3 }
   0xa   : > { %s2606_s26 = smov [#allocation8]   ;;  %s2607_s29 = smov [#allocation7]  }
   0xb   : > { %p2676_p3 = pnand %p1857_p0, %p164_p2  ;;  %s200_s27 = sshll.u32 %s2606_s26, 4  ;;  %s2689_s27 = int_to_ptr.vmem [resolvable:$true] %s200_s27 }
   0xc   : > { %s2691_s30 = sshll.u32 %s2607_s29, 4  ;;  %s2387_s8 = scalar_lea.hbm %s3039_s1, 12288  ;;  %s191_s30 = int_to_ptr.vmem [resolvable:$true] %s2691_s30 }
   0xd   : > { %s3047_s25 = scalar_select %p2676_p3, 1, 0 }
   0xe   : > { %p2100_p5 = pneg %p2676_p3  ;;  %p2388_p7 = scmp.ne.s32.totalorder %s3039_s1, %s2387_s8 }
   0xf   : > { %p2394_p11 = scmp.lt.u32.totalorder %s2387_s8, %s3039_s1 }
  0x10   : > { %p2685_p6 = pnand %p2100_p5, %p3044_p1 }
  0x12   : > { %p2701_p8 = pneg %p2685_p6 }
  0x14   : > { %p2390_p9 = pnand %p2701_p8, %p2388_p7 }
  0x16   : > { %p2391_p10 = pneg %p2390_p9 }
  0x18   : > { %p2396_p12 = pnand %p2394_p11, %p2391_p10 }
  0x1a   : > { %2399 = shalt.err (!%p2396_p12)
}
  0x1b   : > { %s2400_s14 = scalar_lea.vmem %s2674_s23, 12288  ;;  %p2408_p5 = scmp.lt.s32.totalorder %s2674_s23, %s2674_s23 }
  0x1c   : > { %p2401_p13 = scmp.ne.s32.totalorder %s2674_s23, %s2400_s14  ;;  %p2409_p4 = scmp.lt.s32.totalorder %s2400_s14, %s2400_s14 }
  0x1e   : > { %p2403_p0 = pnand %p2401_p13, %p2701_p8  ;;  %p2410_p7 = por %p2409_p4, %p2408_p5 }
  0x20   : > { %p2404_p2 = pneg %p2403_p0 }
  0x22   : > { %p2411_p9 = pnand %p2410_p7, %p2404_p2 }
  0x24   : > { %2414 = shalt.err (!%p2411_p9)
}
  0x25   : > { %s2608_s15 = smov 384   ;;  %s2609_s16 = smov 24  }
  0x26   : > { %2103 = dma.hbm_to_vmem [thread:$0]  (!%p2685_p6), %s3039_s1, 12288, %s2674_s23, [#allocation6], %s2608_s15, %s2608_s15, %s2609_s16  }
  0x27   : > { %s2415_s6 = scalar_lea.hbm %s3041_s3, 4096 }
  0x28   : > { %p2416_p4 = scmp.ne.s32.totalorder %s3041_s3, %s2415_s6  ;;  %p2422_p12 = scmp.lt.u32.totalorder %s2415_s6, %s3041_s3 }
  0x2a   : > { %p2418_p10 = pnand %p2416_p4, %p2701_p8 }
  0x2c   : > { %p2419_p11 = pneg %p2418_p10 }
  0x2e   : > { %p2424_p13 = pnand %p2422_p12, %p2419_p11 }
  0x30   : > { %2427 = shalt.err (!%p2424_p13)
}
  0x31   : > { %s2428_s23 = scalar_lea.vmem %s2689_s27, 4096  ;;  %p2436_p7 = scmp.lt.s32.totalorder %s2689_s27, %s2689_s27 }
  0x32   : > { %p2429_p0 = scmp.ne.s32.totalorder %s2689_s27, %s2428_s23  ;;  %p2437_p9 = scmp.lt.s32.totalorder %s2428_s23, %s2428_s23 }
  0x34   : > { %p2431_p2 = pnand %p2429_p0, %p2701_p8  ;;  %p2438_p4 = por %p2437_p9, %p2436_p7 }
  0x36   : > { %p2432_p5 = pneg %p2431_p2 }
  0x38   : > { %p2439_p10 = pnand %p2438_p4, %p2432_p5 }
  0x3a   : > { %2442 = shalt.err (!%p2439_p10)
}
  0x3b   : > { %s2610_s12 = smov 128   ;;  %s2611_s13 = smov 8  }
  0x3c   : > { %2109 = dma.hbm_to_vmem [thread:$0]  (!%p2685_p6), %s3041_s3, 4096, %s2689_s27, [#allocation9], %s2610_s12, %s2610_s12, %s2611_s13  }
  0x3d   : > { %s2443_s22 = scalar_lea.hbm %s3040_s2, 96 }
  0x3e   : > { %p2444_p11 = scmp.ne.s32.totalorder %s3040_s2, %s2443_s22  ;;  %p2450_p0 = scmp.lt.u32.totalorder %s2443_s22, %s3040_s2 }
  0x40   : > { %p2446_p12 = pnand %p2444_p11, %p2701_p8 }
  0x42   : > { %p2447_p13 = pneg %p2446_p12 }
  0x44   : > { %p2452_p2 = pnand %p2450_p0, %p2447_p13 }
  0x46   : > { %2455 = shalt.err (!%p2452_p2)
}
  0x47   : > { %s2456_s8 = scalar_lea.vmem %s191_s30, 96  ;;  %p2464_p4 = scmp.lt.s32.totalorder %s191_s30, %s191_s30 }
  0x48   : > { %p2457_p5 = scmp.ne.s32.totalorder %s191_s30, %s2456_s8  ;;  %p2465_p10 = scmp.lt.s32.totalorder %s2456_s8, %s2456_s8 }
  0x4a   : > { %p2459_p7 = pnand %p2457_p5, %p2701_p8  ;;  %p2466_p1 = por %p2465_p10, %p2464_p4 }
  0x4c   : > { %p2460_p9 = pneg %p2459_p7 }
  0x4e   : > { %p2467_p3 = pnand %p2466_p1, %p2460_p9 }
  0x50   : > { %2470 = shalt.err (!%p2467_p3)
}
  0x51   : > { %2106 = dma.hbm_to_vmem [thread:$0]  (!%p2685_p6), %s3040_s2, 96, %s191_s30, [#allocation6]  }
  0x52   : > { %s2612_s10 = smov [#allocation10]   ;;  %s2471_s14 = scalar_lea.hbm %s3042_s4, 32 }
  0x53   : > { %s214_s23 = sshll.u32 %s2612_s10, 4  ;;  %p2472_p11 = scmp.ne.s32.totalorder %s3042_s4, %s2471_s14  ;;  %s215_s23 = int_to_ptr.vmem [resolvable:$true] %s214_s23 }
  0x54   : > { %p2478_p12 = scmp.lt.u32.totalorder %s2471_s14, %s3042_s4 }
  0x55   : > { %p2474_p1 = pnand %p2472_p11, %p2701_p8 }
  0x57   : > { %p2475_p3 = pneg %p2474_p1 }
  0x59   : > { %p2480_p13 = pnand %p2478_p12, %p2475_p3 }
  0x5b   : > { %2483 = shalt.err (!%p2480_p13)
}
  0x5c   : > { %s2484_s30 = scalar_lea.vmem %s215_s23, 32  ;;  %p2492_p7 = scmp.lt.s32.totalorder %s215_s23, %s215_s23 }
  0x5d   : > { %p2485_p0 = scmp.ne.s32.totalorder %s215_s23, %s2484_s30  ;;  %p2493_p9 = scmp.lt.s32.totalorder %s2484_s30, %s2484_s30 }
  0x5f   : > { %p2487_p2 = pnand %p2485_p0, %p2701_p8  ;;  %p2494_p4 = por %p2493_p9, %p2492_p7 }
  0x61   : > { %p2488_p5 = pneg %p2487_p2 }
  0x63   : > { %p2495_p10 = pnand %p2494_p4, %p2488_p5 }
  0x65   : > { %2498 = shalt.err (!%p2495_p10)
}
  0x66   : > { %2112 = dma.hbm_to_vmem [thread:$0]  (!%p2685_p6), %s3042_s4, 32, %s215_s23, [#allocation9]  }
  0x67   : > { %s1856_s11 = sadd.s32 4294967294, %s2603_s21   ;;  %s2784_s28 = sadd.s32 1, %s2603_s21  }
  0x68   : > { %s27_s6 = ssub.s32 %s2603_s21, %s2784_s28  ;;  %s30_s7 = sadd.s32 1, %s2599_s20 }
  0x69   : > { %p28_p8 = scmp.eq.s32.totalorder %s27_s6, 0  ;;  %p37_p11 = scmp.ne.s32.totalorder %s2599_s20, %s2595_s19 }
  0x6a   : > { %p38_p1 = scmp.eq.s32.totalorder %s2603_s21, 0  ;;  %p43_p3 = scmp.ne.s32.totalorder %s2595_s19, %s2591_s18 }
  0x6b   : > { %s2795_s8 = scalar_select %p28_p8, %s2599_s20, %s30_s7  }
  0x6c   : > { %p2797_p12 = por %p38_p1, %p37_p11  ;;  %p3051_p13 = scmp.eq.s32.totalorder %s2669_s24, 0 }
  0x6d   : > { %p151_p0 = scmp.eq.s32.totalorder %s2669_s24, 1  ;;  %p157_p2 = scmp.eq.s32.totalorder %s1856_s11, 1 }
  0x6e   : > { %p2803_p6 = por %p3051_p13, %p43_p3  ;;  %p2125_p5 = scmp.lt.s32.totalorder %s2603_s21, 2 }
  0x6f   : > { %s225_s10 = sand.u32 1, %s2599_s20   ;;  %p2810_p7 = por %p151_p0, %p37_p11 }
  0x70   : > { %p2814_p9 = por %p157_p2, %p43_p3  ;;  %s1863_s13 = sshll.u32 %s225_s10, 4 }
  0x71   : > { %s3053_s23 = scalar_select %p2810_p7, 1, 0 }
  0x72   : > { %s3054_s12 = scalar_select %p2814_p9, 1, 0 }
  0x73   : > { %s2014_s14 = sshll.u32 %s2603_s21, 8  ;;  %s229_s22 = scalar_lea.vmem [#allocation2], %s1863_s13 }
  0x74   : > { %s2822_s17 = scalar_lea.hbm %s3038_s0, %s2014_s14  ;;  %s237_s30 = sshll.u32 %s229_s22, 4  ;;  %s2824_s30 = int_to_ptr.vmem [resolvable:$true] %s237_s30 }
  0x75   : > { %p2828_p4 = pnand %p2125_p5, %p2797_p12  ;;  %s226_s29 = scalar_lea.sflag [#allocation3], %s225_s10 }
  0x76   : > { %s2499_s11 = scalar_lea.hbm %s2822_s17, 256  ;;  %s2504_s13 = scalar_lea.hbm %s3038_s0, 512 }
  0x77   : > { %p2500_p10 = scmp.ne.s32.totalorder %s2822_s17, %s2499_s11  ;;  %p2501_p8 = pneg %p2828_p4 }
  0x78   : > { %p2505_p3 = scmp.lt.u32.totalorder %s2822_s17, %s3038_s0  ;;  %p2506_p12 = scmp.lt.u32.totalorder %s2504_s13, %s2499_s11 }
  0x79   : > { %p2502_p11 = pnand %p2501_p8, %p2500_p10  ;;  %p2508_p0 = scmp.lt.u32.totalorder %s2499_s11, %s2822_s17 }
  0x7a   : > { %p2507_p13 = por %p2506_p12, %p2505_p3 }
  0x7b   : > { %p2503_p1 = pneg %p2502_p11 }
  0x7c   : > { %p2509_p2 = por %p2508_p0, %p2507_p13 }
  0x7e   : > { %p2510_p5 = pnand %p2509_p2, %p2503_p1 }
  0x80   : > { %2513 = shalt.err (!%p2510_p5)
}
  0x81   : > { %s2514_s10 = scalar_lea.vmem %s2824_s30, 256  ;;  %s2613_s15 = smov [#allocation2]  }
  0x82   : > { %p2515_p10 = scmp.ne.s32.totalorder %s2824_s30, %s2514_s10  ;;  %s2519_s16 = sshll.u32 %s2613_s15, 4  ;;  %s2520_s16 = int_to_ptr.vmem [resolvable:$false] %s2519_s16 }
  0x83   : > { %s2521_s22 = scalar_lea.vmem %s2520_s16, 512  ;;  %p2522_p7 = scmp.lt.s32.totalorder %s2824_s30, %s2520_s16 }
  0x84   : > { %p2517_p11 = pnand %p2515_p10, %p2501_p8  ;;  %p2523_p3 = scmp.lt.s32.totalorder %s2521_s22, %s2514_s10 }
  0x86   : > { %p2518_p9 = pneg %p2517_p11  ;;  %p2524_p12 = por %p2523_p3, %p2522_p7 }
  0x88   : > { %p2525_p13 = pnand %p2524_p12, %p2518_p9 }
  0x8a   : > { %2528 = shalt.err (!%p2525_p13)
}
  0x8b   : > { %2116 = dma.hbm_to_vmem [thread:$0]  (!%p2828_p4), %s2822_s17, 256, %s2824_s30, %s226_s29  }
  0x8c   : > { %p3056_p1 = scmp.ne.s32.totalorder %s3047_s25, 0 }
  0x8d   : > { %s2860_s11 = sand.u32 (!%p3056_p1), 1, %s2595_s19  }
  0x8e   : > { %246 = sbr.rel (%p3056_p1) target bundleno = 2523 (0x9db), region = 40  ;;  %s1867_s6 = sshll.u32 (!%p3056_p1), %s2860_s11, 4 }
  0x8f   : > { %s249_s7 = scalar_lea.sflag (!%p3056_p1), [#allocation3], %s2860_s11  ;;  %s2866_s13 = scalar_lea.vmem (!%p3056_p1), [#allocation2], %s1867_s6 }
  0x95   : > { %2574 = dma.done.wait (%p2803_p6), %s249_s7, 256  }
  0x96   : > { %2576 = vsyncadd (%p2803_p6), %s249_s7, 4294967040  ;;  %p3057_p7 = scmp.eq.s32.totalorder %s2669_s24, 0 }
  0x98   : > { %2578 = dma.done.wait (%p3057_p7), [#allocation6], 12384   ;;  %p3058_p9 = pmov %p3057_p7 }
  0x99   : > { %p3059_p4 = pmov %p3057_p7 }
  0x9a   : > { %2580 = vsyncadd (%p3058_p9), [#allocation6], 4294954912 }
  0x9b   : > { %2582 = dma.done.wait (%p3059_p4), [#allocation9], 4128   ;;  %p3060_p8 = pmov %p3059_p4 }
  0x9c   : > { %v2179_v0 = vld [vmem:[#allocation5 + $0xc] ss:$24 sps:$4 sm:$0xff]   ;;  %v2181_v1 = vld [vmem:[#allocation5 + $0x8] ss:$24 sps:$4 sm:$0xff]   ;;  %v2182_v2 = vld [vmem:[#allocation5 + $0x3c] ss:$24 sps:$4 sm:$0xff]  }
  0x9d   : > { %2584 = vsyncadd (%p3060_p8), [#allocation9], 4294963168  ;;  %949 = vmatprep.subr.bf16.mxu1 %v2179_v0  ;;  %v2184_v3 = vld [vmem:[#allocation5 + $0x38] ss:$24 sps:$4 sm:$0xff]   ;;  %v2185_v4 = vld [vmem:[#allocation5 + $0x4] ss:$24 sps:$4 sm:$0xff]  }
  0x9e   : > { %950 = vmatpush1.bf16.msra.mxu1 %v2181_v1  ;;  %v2187_v5 = vld [vmem:[#allocation5] ss:$24 sps:$4 sm:$0xff]   ;;  %v2188_v6 = vld [vmem:[#allocation5 + $0x6c] ss:$24 sps:$4 sm:$0xff]   ;;  %908 = vmatprep.subr.bf16.mxu0 %v2185_v4  ;;  %v2193_v8 = vld [vmem:[#allocation5 + $0x30] ss:$24 sps:$4 sm:$0xff]  }
  0x9f   : > { %951 = vmatprep.subr.bf16.mxu1 %v2182_v2  ;;  %909 = vmatpush1.bf16.msra.mxu0 %v2187_v5  ;;  %v2191_v7 = vld [vmem:[#allocation5 + $0x34] ss:$24 sps:$4 sm:$0xff]   ;;  %v2190_v9 = vld [vmem:[#allocation5 + $0x68] ss:$24 sps:$4 sm:$0xff]   ;;  %v2197_v11 = vld [vmem:[#allocation5 + $0x64] ss:$24 sps:$4 sm:$0xff]  }
  0xa0   : > { %v2194_v10 = vld [vmem:[#allocation5 + $0x9c] ss:$24 sps:$4 sm:$0xff]   ;;  %910 = vmatprep.subr.bf16.mxu0 %v2191_v7  ;;  %v2199_v12 = vld [vmem:[#allocation5 + $0x60] ss:$24 sps:$4 sm:$0xff]   ;;  %v2200_v15 = vld [vmem:[#allocation5 + $0xcc] ss:$24 sps:$4 sm:$0xff]  }
  0xa1   : > { %v2196_v13 = vld [vmem:[#allocation5 + $0x98] ss:$24 sps:$4 sm:$0xff]   ;;  %v2203_v14 = vld [vmem:[#allocation5 + $0x94] ss:$24 sps:$4 sm:$0xff]   ;;  %v2202_v17 = vld [vmem:[#allocation5 + $0xc8] ss:$24 sps:$4 sm:$0xff]  }
  0xa2   : > { %952 = vmatpush1.bf16.msra.mxu1 %v2184_v3  ;;  %v2205_v16 = vld [vmem:[#allocation5 + $0x90] ss:$24 sps:$4 sm:$0xff]   ;;  %v2209_v18 = vld [vmem:[#allocation5 + $0xc4] ss:$24 sps:$4 sm:$0xff]   ;;  %v2211_v20 = vld [vmem:[#allocation5 + $0xc0] ss:$24 sps:$4 sm:$0xff]  }
  0xa3   : > { %953 = vmatprep.subr.bf16.mxu1 %v2188_v6  ;;  %911 = vmatpush1.bf16.msra.mxu0 %v2193_v8  ;;  %v2206_v19 = vld [vmem:[#allocation5 + $0xfc] ss:$24 sps:$4 sm:$0xff]   ;;  %v2208_v21 = vld [vmem:[#allocation5 + $0xf8] ss:$24 sps:$4 sm:$0xff]   ;;  %v2212_v23 = vld [vmem:[#allocation5 + $0x12c] ss:$24 sps:$4 sm:$0xff]  }
  0xa4   : > { %912 = vmatprep.subr.bf16.mxu0 %v2197_v11  ;;  %v2215_v22 = vld [vmem:[#allocation5 + $0xf4] ss:$24 sps:$4 sm:$0xff]   ;;  %v2217_v24 = vld [vmem:[#allocation5 + $0xf0] ss:$24 sps:$4 sm:$0xff]   ;;  %v2221_v26 = vld [vmem:[#allocation5 + $0x124] ss:$24 sps:$4 sm:$0xff]  }
  0xa5   : > { %v2214_v25 = vld [vmem:[#allocation5 + $0x128] ss:$24 sps:$4 sm:$0xff]   ;;  %v2218_v27 = vld [vmem:[#allocation5 + $0x15c] ss:$24 sps:$4 sm:$0xff]   ;;  %v2220_v29 = vld [vmem:[#allocation5 + $0x158] ss:$24 sps:$4 sm:$0xff]  }
  0xa6   : > { %954 = vmatpush1.bf16.msra.mxu1 %v2190_v9  ;;  %v2223_v28 = vld [vmem:[#allocation5 + $0x120] ss:$24 sps:$4 sm:$0xff]   ;;  %v2227_v30 = vld [vmem:[#allocation5 + $0x154] ss:$24 sps:$4 sm:$0xff]   ;;  %v2229_v32 = vld [vmem:[#allocation5 + $0x150] ss:$24 sps:$4 sm:$0xff]  }
  0xa7   : > { %955 = vmatprep.subr.bf16.mxu1 %v2194_v10  ;;  %913 = vmatpush1.bf16.msra.mxu0 %v2199_v12  ;;  %v2224_v31 = vld [vmem:[#allocation5 + $0x18c] ss:$24 sps:$4 sm:$0xff]   ;;  %v2226_v33 = vld [vmem:[#allocation5 + $0x188] ss:$24 sps:$4 sm:$0xff]   ;;  %v2230_v35 = vld [vmem:[#allocation5 + $0x1bc] ss:$24 sps:$4 sm:$0xff]  }
  0xa8   : > { %914 = vmatprep.subr.bf16.mxu0 %v2203_v14  ;;  %v2233_v34 = vld [vmem:[#allocation5 + $0x184] ss:$24 sps:$4 sm:$0xff]   ;;  %v2235_v36 = vld [vmem:[#allocation5 + $0x180] ss:$24 sps:$4 sm:$0xff]   ;;  %v2239_v38 = vld [vmem:[#allocation5 + $0x1b4] ss:$24 sps:$4 sm:$0xff]  }
  0xa9   : > { %v2232_v37 = vld [vmem:[#allocation5 + $0x1b8] ss:$24 sps:$4 sm:$0xff]   ;;  %v2236_v39 = vld [vmem:[#allocation5 + $0x1ec] ss:$24 sps:$4 sm:$0xff]   ;;  %v2238_v41 = vld [vmem:[#allocation5 + $0x1e8] ss:$24 sps:$4 sm:$0xff]  }
  0xaa   : > { %956 = vmatpush1.bf16.msra.mxu1 %v2196_v13  ;;  %v2241_v40 = vld [vmem:[#allocation5 + $0x1b0] ss:$24 sps:$4 sm:$0xff]   ;;  %v2245_v42 = vld [vmem:[#allocation5 + $0x1e4] ss:$24 sps:$4 sm:$0xff]   ;;  %v2247_v46 = vld [vmem:[#allocation5 + $0x1e0] ss:$24 sps:$4 sm:$0xff]  }
  0xab   : > { %957 = vmatprep.subr.bf16.mxu1 %v2200_v15  ;;  %915 = vmatpush1.bf16.msra.mxu0 %v2205_v16  ;;  %v2242_v43 = vld [vmem:[#allocation5 + $0x21c] ss:$24 sps:$4 sm:$0xff]   ;;  %v2244_v44 = vld [vmem:[#allocation5 + $0x218] ss:$24 sps:$4 sm:$0xff]   ;;  %v2248_v48 = vld [vmem:[#allocation5 + $0x24c] ss:$24 sps:$4 sm:$0xff]  }
  0xac   : > { %916 = vmatprep.subr.bf16.mxu0 %v2209_v18  ;;  %v297_v45 = vld [vmem:[%s2866_s13 + $0x8] sm:$0xff]  ;;  %v296_v0 = vld [vmem:[%s2866_s13] sm:$0xff]  ;;  %v2614_v4 = vmov 0.0   ;;  %vm2615_vm0 = vmmov 0   ;;  %vm1037_vm1 = vcmask 523264   ;;  %s2616_s25 = smov 64  }
  0xad   : > { %v299_v47 = vpack.c.bf16 %v297_v45, %v297_v45  ;;  %v2251_v49 = vld [vmem:[#allocation5 + $0x214] ss:$24 sps:$4 sm:$0xff]   ;;  %v2253_v50 = vld [vmem:[#allocation5 + $0x210] ss:$24 sps:$4 sm:$0xff]   ;;  %v2257_v52 = vld [vmem:[#allocation5 + $0x244] ss:$24 sps:$4 sm:$0xff]   ;;  %v2882_v3 = vpack.c.bf16 %v296_v0, %v296_v0 }
  0xae   : > { %958 = vmatpush1.bf16.msra.mxu1 %v2202_v17  ;;  %v2250_v51 = vld [vmem:[#allocation5 + $0x248] ss:$24 sps:$4 sm:$0xff]   ;;  %v2254_v53 = vld [vmem:[#allocation5 + $0x27c] ss:$24 sps:$4 sm:$0xff]   ;;  %v2256_v55 = vld [vmem:[#allocation5 + $0x278] ss:$24 sps:$4 sm:$0xff]  }
  0xaf   : > { %959 = vmatprep.subr.bf16.mxu1 %v2206_v19  ;;  %917 = vmatpush1.bf16.msra.mxu0 %v2211_v20  ;;  %v2259_v54 = vld [vmem:[#allocation5 + $0x240] ss:$24 sps:$4 sm:$0xff]   ;;  %v2263_v56 = vld [vmem:[#allocation5 + $0x274] ss:$24 sps:$4 sm:$0xff]   ;;  %v2265_v58 = vld [vmem:[#allocation5 + $0x270] ss:$24 sps:$4 sm:$0xff]  }
  0xb0   : > { %918 = vmatprep.subr.bf16.mxu0 %v2215_v22  ;;  %981 = vmatprep.mubr.bf16.mxu1 %v299_v47  ;;  %v2260_v57 = vld [vmem:[#allocation5 + $0x2ac] ss:$24 sps:$4 sm:$0xff]   ;;  %v2262_v59 = vld [vmem:[#allocation5 + $0x2a8] ss:$24 sps:$4 sm:$0xff]   ;;  %v2266_v61 = vld [vmem:[#allocation5 + $0x2dc] ss:$24 sps:$4 sm:$0xff]  }
  0xb1   : > { %940 = vmatprep.mubr.bf16.mxu0 %v299_v47  ;;  %v2269_v60 = vld [vmem:[#allocation5 + $0x2a4] ss:$24 sps:$4 sm:$0xff]   ;;  %v2271_v62 = vld [vmem:[#allocation5 + $0x2a0] ss:$24 sps:$4 sm:$0xff]   ;;  %v2272_v1 = vld [vmem:[#allocation5 + $0x2d4] ss:$24 sps:$4 sm:$0xff]  }
  0xb2   : > { %960 = vmatpush1.bf16.msra.mxu1 %v2208_v21  ;;  %v2268_v63 = vld [vmem:[#allocation5 + $0x2d8] ss:$24 sps:$4 sm:$0xff]   ;;  %v2277_v6 = vld [vmem:[#allocation5 + $0x14] ss:$24 sps:$4 sm:$0xff]   ;;  %v2280_v7 = vld [vmem:[#allocation5 + $0x44] ss:$24 sps:$4 sm:$0xff]  }
  0xb3   : > { %961 = vmatprep.subr.bf16.mxu1 %v2212_v23  ;;  %919 = vmatpush1.bf16.msra.mxu0 %v2217_v24  ;;  %v2274_v2 = vld [vmem:[#allocation5 + $0x2d0] ss:$24 sps:$4 sm:$0xff]   ;;  %v2278_v8 = vld [vmem:[#allocation5 + $0x40] ss:$24 sps:$4 sm:$0xff]   ;;  %v2283_v9 = vld [vmem:[#allocation5 + $0x74] ss:$24 sps:$4 sm:$0xff]   ;;  %v398_v23 = vlaneseq }
  0xb4   : > { %920 = vmatprep.subr.bf16.mxu0 %v2221_v26  ;;  %v2275_v5 = vld [vmem:[#allocation5 + $0x10] ss:$24 sps:$4 sm:$0xff]   ;;  %v2286_v11 = vld [vmem:[#allocation5 + $0xa4] ss:$24 sps:$4 sm:$0xff]   ;;  %v2284_v12 = vld [vmem:[#allocation5 + $0xa0] ss:$24 sps:$4 sm:$0xff]  }
  0xb5   : > { %v2281_v10 = vld [vmem:[#allocation5 + $0x70] ss:$24 sps:$4 sm:$0xff]   ;;  %v2289_v13 = vld [vmem:[#allocation5 + $0xd4] ss:$24 sps:$4 sm:$0xff]   ;;  %v2292_v15 = vld [vmem:[#allocation5 + $0x104] ss:$24 sps:$4 sm:$0xff]  }
  0xb6   : > { %962 = vmatpush1.bf16.msra.mxu1 %v2214_v25  ;;  %v2287_v14 = vld [vmem:[#allocation5 + $0xd0] ss:$24 sps:$4 sm:$0xff]   ;;  %v2290_v16 = vld [vmem:[#allocation5 + $0x100] ss:$24 sps:$4 sm:$0xff]   ;;  %v2295_v17 = vld [vmem:[#allocation5 + $0x134] ss:$24 sps:$4 sm:$0xff]  }
  0xb7   : > { %963 = vmatprep.subr.bf16.mxu1 %v2218_v27  ;;  %921 = vmatpush1.bf16.msra.mxu0 %v2223_v28  ;;  %v2293_v18 = vld [vmem:[#allocation5 + $0x130] ss:$24 sps:$4 sm:$0xff]   ;;  %v2298_v19 = vld [vmem:[#allocation5 + $0x164] ss:$24 sps:$4 sm:$0xff]   ;;  %v2296_v20 = vld [vmem:[#allocation5 + $0x160] ss:$24 sps:$4 sm:$0xff]  }
  0xb8   : > { %922 = vmatprep.subr.bf16.mxu0 %v2227_v30  ;;  %v2301_v21 = vld [vmem:[#allocation5 + $0x194] ss:$24 sps:$4 sm:$0xff]   ;;  %v2299_v22 = vld [vmem:[#allocation5 + $0x190] ss:$24 sps:$4 sm:$0xff]   ;;  %v2889_v24 = vshrl.u32 %v398_v23, 7  ;;  %vm1084_vm2 = vcmask 64512  }
  0xb9   : > { %v2892_v26 = vld [vmem:[#allocation7] sm:$0x3f]  ;;  %vm1099_vm3 = vcmask 1043456   ;;  %s2015_s9 = sshll.u32 %s2669_s24, 8  ;;  %s294_s17 = scalar_lea.vmem [#allocation11], %s1867_s6 }
  0xba   : > { %964 = vmatpush1.bf16.msra.mxu1 %v2220_v29  ;;  %v408_v25 = vsub.s32 2, %v2889_v24  ;;  %v2302_v27 = vld [vmem:[#allocation5 + $0x1c0] ss:$24 sps:$4 sm:$0xff]   ;;  %v2304_v28 = vld [vmem:[#allocation5 + $0x1c4] ss:$24 sps:$4 sm:$0xff]   ;;  %v400_v30 = vsub.s32 0, %v2889_v24  ;;  %s2994_s27 = scalar_lea.hbm %s3043_s5, %s2015_s9 }
  0xbb   : > { %965 = vmatprep.subr.bf16.mxu1 %v2224_v31  ;;  %923 = vmatpush1.bf16.msra.mxu0 %v2229_v32  ;;  %v2307_v29 = vld [vmem:[#allocation5 + $0x1f4] ss:$24 sps:$4 sm:$0xff]   ;;  %v2305_v32 = vld [vmem:[#allocation5 + $0x1f0] ss:$24 sps:$4 sm:$0xff]   ;;  %s1748_s30 = sshll.u32 %s294_s17, 4  ;;  %s1734_s24 = scalar_lea.sflag [#allocation4], %s2860_s11  ;;  %s2996_s30 = int_to_ptr.vmem [resolvable:$true] %s1748_s30 }
  0xbc   : > { %924 = vmatprep.subr.bf16.mxu0 %v2233_v34  ;;  %v409_v31 = vrot.slane %v2892_v26, %v408_v25  ;;  %s2529_s14 = scalar_lea.vmem %s2996_s30, 256  ;;  %p3061_p0 = scmp.ne.s32.totalorder %s3053_s23, 0 }
  0xbd   : > { %p2530_p6 = scmp.ne.s32.totalorder %s2996_s30, %s2529_s14  ;;  %s2617_s10 = smov [#allocation11]  }
  0xbe   : > { %966 = vmatpush1.bf16.msra.mxu1 %v2226_v33  ;;  %v2310_v33 = vld [vmem:[#allocation5 + $0x224] ss:$24 sps:$4 sm:$0xff]   ;;  %s2533_s15 = sshll.u32 %s2617_s10, 4  ;;  %s2534_s15 = int_to_ptr.vmem [resolvable:$false] %s2533_s15 }
  0xbf   : > { %967 = vmatprep.subr.bf16.mxu1 %v2230_v35  ;;  %925 = vmatpush1.bf16.msra.mxu0 %v2235_v36  ;;  %v401_v35 = vrot.slane %v2892_v26, %v400_v30  ;;  %p2531_p2 = pnand %p2530_p6, %p3061_p0  ;;  %s2535_s16 = scalar_lea.vmem %s2534_s15, 512 }
  0xc0   : > { %926 = vmatprep.subr.bf16.mxu0 %v2239_v38  ;;  %v2308_v38 = vld [vmem:[#allocation5 + $0x220] ss:$24 sps:$4 sm:$0xff]   ;;  %p2536_p10 = scmp.lt.s32.totalorder %s2996_s30, %s2534_s15  ;;  %p2537_p11 = scmp.lt.s32.totalorder %s2535_s16, %s2529_s14 }
  0xc1   : > { %p2532_p5 = pneg %p2531_p2 }
  0xc2   : > { %968 = vmatpush1.bf16.msra.mxu1 %v2232_v37  ;;  %p2538_p3 = por %p2537_p11, %p2536_p10 }
  0xc3   : > { %969 = vmatprep.subr.bf16.mxu1 %v2236_v39  ;;  %927 = vmatpush1.bf16.msra.mxu0 %v2241_v40  ;;  %v2313_v40 = vld [vmem:[#allocation5 + $0x254] ss:$24 sps:$4 sm:$0xff]  }
  0xc4   : > { %928 = vmatprep.subr.bf16.mxu0 %v2245_v42  ;;  %p2539_p12 = pnand %p2538_p3, %p2532_p5 }
  0xc6   : > { %970 = vmatpush1.bf16.msra.mxu1 %v2238_v41 }
  0xc7   : > { %971 = vmatprep.subr.bf16.mxu1 %v2242_v43  ;;  %929 = vmatpush1.bf16.msra.mxu0 %v2247_v46 }
  0xc8   : > { %930 = vmatprep.subr.bf16.mxu0 %v2251_v49 }
  0xca   : > { %972 = vmatpush1.bf16.msra.mxu1 %v2244_v44 }
  0xcb   : > { %973 = vmatprep.subr.bf16.mxu1 %v2248_v48  ;;  %931 = vmatpush1.bf16.msra.mxu0 %v2253_v50  ;;  %v2311_v48 = vld [vmem:[#allocation5 + $0x250] ss:$24 sps:$4 sm:$0xff]  }
  0xcc   : > { %932 = vmatprep.subr.bf16.mxu0 %v2257_v52  ;;  %v2314_v52 = vld [vmem:[#allocation5 + $0x280] ss:$24 sps:$4 sm:$0xff]  }
  0xce   : > { %974 = vmatpush1.bf16.msra.mxu1 %v2250_v51  ;;  %v2316_v51 = vld [vmem:[#allocation5 + $0x284] ss:$24 sps:$4 sm:$0xff]  }
  0xcf   : > { %975 = vmatprep.subr.bf16.mxu1 %v2254_v53  ;;  %933 = vmatpush1.bf16.msra.mxu0 %v2259_v54  ;;  %v2319_v53 = vld [vmem:[#allocation5 + $0x2b4] ss:$24 sps:$4 sm:$0xff]   ;;  %v2317_v54 = vld [vmem:[#allocation5 + $0x2b0] ss:$24 sps:$4 sm:$0xff]  }
  0xd0   : > { %934 = vmatprep.subr.bf16.mxu0 %v2263_v56  ;;  %v2320_v56 = vld [vmem:[#allocation5 + $0x2e0] ss:$24 sps:$4 sm:$0xff]  }
  0xd2   : > { %976 = vmatpush1.bf16.msra.mxu1 %v2256_v55  ;;  %v2322_v55 = vld [vmem:[#allocation5 + $0x2e4] ss:$24 sps:$4 sm:$0xff]  }
  0xd3   : > { %977 = vmatprep.subr.bf16.mxu1 %v2260_v57  ;;  %935 = vmatpush1.bf16.msra.mxu0 %v2265_v58 }
  0xd4   : > { %936 = vmatprep.subr.bf16.mxu0 %v2269_v60 }
  0xd6   : > { %978 = vmatpush1.bf16.msra.mxu1 %v2262_v59 }
  0xd7   : > { %979 = vmatprep.subr.bf16.mxu1 %v2266_v61  ;;  %937 = vmatpush1.bf16.msra.mxu0 %v2271_v62  ;;  %v416_v62 = vsub.s32 4, %v2889_v24 }
  0xd8   : > { %938 = vmatprep.subr.bf16.mxu0 %v2272_v1 }
  0xd9   : > { %v417_v0 = vrot.slane %v2892_v26, %v416_v62 }
  0xda   : > { %980 = vmatpush1.bf16.msra.mxu1 %v2268_v63 }
  0xdb   : > { %939 = vmatpush1.bf16.msra.mxu0 %v2274_v2  ;;  %2032 = vmatprep.subr.bf16.mxu1 %v2614_v4 }
  0xdc   : > { %990 = vmatprep.subr.bf16.mxu0 %v2277_v6 }
  0xdd   : > { %982 = vmatmul.mubr.bf16.vlgmr.msra.gmra.mrb[0].mxu1 %v2882_v3 }
  0xde   : > { %941 = vmatmul.mubr.bf16.vlgmr.msra.gmra.mrb[0].mxu0 %v2882_v3  ;;  %2034 = vmatprep.mubr.msk.bf16.mxu1 %vm2615_vm0, %v2614_v4 }
  0xdf   : > { %1022 = vmatprep.mubr.bf16.mxu0 %v299_v47  ;;  %991 = vmatpush1.bf16.msra.mxu0 %v2275_v5 }
  0xe0   : > { %992 = vmatprep.subr.bf16.mxu0 %v2280_v7 }
  0xe3   : > { %993 = vmatpush1.bf16.msra.mxu0 %v2278_v8 }
  0xe4   : > { %994 = vmatprep.subr.bf16.mxu0 %v2283_v9 }
  0xe7   : > { %995 = vmatpush1.bf16.msra.mxu0 %v2281_v10 }
  0xe8   : > { %996 = vmatprep.subr.bf16.mxu0 %v2286_v11 }
  0xeb   : > { %997 = vmatpush1.bf16.msra.mxu0 %v2284_v12 }
  0xec   : > { %998 = vmatprep.subr.bf16.mxu0 %v2289_v13 }
  0xef   : > { %999 = vmatpush1.bf16.msra.mxu0 %v2287_v14 }
  0xf0   : > { %1000 = vmatprep.subr.bf16.mxu0 %v2292_v15 }
  0xf3   : > { %1001 = vmatpush1.bf16.msra.mxu0 %v2290_v16 }
  0xf4   : > { %1002 = vmatprep.subr.bf16.mxu0 %v2295_v17 }
  0xf7   : > { %1003 = vmatpush1.bf16.msra.mxu0 %v2293_v18 }
  0xf8   : > { %1004 = vmatprep.subr.bf16.mxu0 %v2298_v19 }
  0xfb   : > { %1005 = vmatpush1.bf16.msra.mxu0 %v2296_v20 }
  0xfc   : > { %1006 = vmatprep.subr.bf16.mxu0 %v2301_v21 }
  0xff   : > { %1007 = vmatpush1.bf16.msra.mxu0 %v2299_v22 }
 0x100   : > { %1008 = vmatprep.subr.bf16.mxu0 %v2304_v28 }
 0x103   : > { %1009 = vmatpush1.bf16.msra.mxu0 %v2302_v27 }
 0x104   : > { %1010 = vmatprep.subr.bf16.mxu0 %v2307_v29  ;;  %v412_v29 = vsub.s32 3, %v2889_v24 }
 0x107   : > { %1011 = vmatpush1.bf16.msra.mxu0 %v2305_v32  ;;  %v404_v32 = vsub.s32 1, %v2889_v24 }
 0x108   : > { %1012 = vmatprep.subr.bf16.mxu0 %v2310_v33 }
 0x10b   : > { %1013 = vmatpush1.bf16.msra.mxu0 %v2308_v38 }
 0x10c   : > { %1014 = vmatprep.subr.bf16.mxu0 %v2313_v40 }
 0x10f   : > { %1015 = vmatpush1.bf16.msra.mxu0 %v2311_v48 }
 0x110   : > { %1016 = vmatprep.subr.bf16.mxu0 %v2316_v51 }
 0x113   : > { %1017 = vmatpush1.bf16.msra.mxu0 %v2314_v52 }
 0x114   : > { %1018 = vmatprep.subr.bf16.mxu0 %v2319_v53 }
 0x117   : > { %1019 = vmatpush1.bf16.msra.mxu0 %v2317_v54 }
 0x118   : > { %1020 = vmatprep.subr.bf16.mxu0 %v2322_v55 }
 0x11b   : > { %1021 = vmatpush1.bf16.msra.mxu0 %v2320_v56 }
 0x11e   : > { %1023 = vmatmul.mubr.bf16.vlgmr.msra.gmra.mrb[4].mxu0 %v2882_v3 }
 0x1b0   : > { %v983_v34 = vpop.f32.mrb[0].mxu1 }
 0x1b1   : > { %v984_v36 = vadd.f32 %v983_v34, %v409_v31  ;;  %v2899_v37 = vpop.f32.mrb[1].mxu1  ;;  %v942_v43 = vpop.f32.mrb[0].mxu0  ;;  %v413_v31 = vrot.slane %v2892_v26, %v412_v29  ;;  %v405_v34 = vrot.slane %v2892_v26, %v404_v32  ;;  %v2331_v29 = vld [vmem:[#allocation8 + $0x24] ss:$8 sps:$4 sm:$0xff]  }
 0x1b2   : > { %v987_v39 = vpop.f32.mrb[2].mxu1  ;;  %v943_v44 = vadd.f32 %v942_v43, %v401_v35  ;;  %v2901_v45 = vpop.f32.mrb[1].mxu0  ;;  %v420_v35 = vsub.s32 5, %v2889_v24 }
 0x1b3   : > { %v1033_v41 = vpack.c.bf16 %v984_v36, %v984_v36  ;;  %v988_v42 = vpop.f32.mrb[3].mxu1  ;;  %v946_v47 = vpop.f32.mrb[2].mxu0  ;;  %v986_v33 = vadd.f32 %v2899_v37, %v413_v31  ;;  %v945_v38 = vadd.f32 %v2901_v45, %v405_v34  ;;  %v2329_v31 = vld [vmem:[#allocation8 + $0x20] ss:$8 sps:$4 sm:$0xff]   ;;  %v2332_v34 = vld [vmem:[#allocation8 + $0x30] ss:$8 sps:$4 sm:$0xff]  }
 0x1b4   : > { %v1031_v49 = vpack.c.bf16 %v943_v44, %v943_v44  ;;  %v947_v50 = vpop.f32.mrb[3].mxu0  ;;  %v421_v39 = vrot.slane %v2892_v26, %v420_v35  ;;  %v2337_v35 = vld [vmem:[#allocation8 + $0x44] ss:$8 sps:$4 sm:$0xff]  }
 0x1b5   : > { %v1042_v46 = vsel %vm1037_vm1, %v1033_v41, 0  ;;  %v1034_v36 = vpack.c.bf16 %v986_v33, %v986_v33  ;;  %v1032_v40 = vpack.c.bf16 %v945_v38, %v945_v38  ;;  %v2334_v33 = vld [vmem:[#allocation8 + $0x34] ss:$8 sps:$4 sm:$0xff]   ;;  %v2338_v38 = vld [vmem:[#allocation8 + $0x50] ss:$8 sps:$4 sm:$0xff]  }
 0x1b6   : > { %2033 = vmatpush3.bf16.xpose.msra.mxu1 %v1042_v46  ;;  %1145 = vrot.lane.b32.xlu1 %v1031_v49, %s2616_s25 }
 0x1b7   : > { %2038 = vmatprep.subr.bf16.mxu1 %v2614_v4  ;;  %v1261_v26 = vsel %vm1037_vm1, %v1034_v36, 0 }
 0x1bd   : > { %2035 = vmatmul.mubr.msk.bf16.vlgmr.msra.gmra.mrb[4].mxu1 %vm1037_vm1, %v1031_v49 }
 0x1be   : > { %2040 = vmatprep.mubr.msk.bf16.mxu1 %vm2615_vm0, %v2614_v4 }
 0x1f1   : > { %v1024_v63 = vpop.f32.mrb[4].mxu0 }
 0x1f2   : > { %v1026_v1 = vpop.f32.mrb[5].mxu0  ;;  %v1025_v5 = vadd.f32 %v1024_v63, %v417_v0 }
 0x1f3   : > { %v1028_v2 = vpop.f32.mrb[6].mxu0 }
 0x1f4   : > { %v1029_v6 = vpop.f32.mrb[7].mxu0  ;;  %v1035_v7 = vpack.c.bf16 %v1025_v5, %v1025_v5 }
 0x1f6   : > { %v1101_v3 = vsel %vm1099_vm3, %v1035_v7, 0 }
 0x1f7   : > { %2039 = vmatpush3.bf16.msra.mxu1 %v1101_v3 }
 0x1f8   : > { %2044 = vmatprep.subr.bf16.mxu1 %v2614_v4 }
 0x228   : > { %v1146_v17 = vpop.permute.xlu1 %1145 }
 0x290   : > { %v1078_v57 = vpop.f32.mrb[4].mxu1 }
 0x291   : > { %v2036_v58 = vpop.f32.mrb[5].mxu1  ;;  %v1085_v59 = vsel %vm1084_vm2, %v1078_v57, -inf }
 0x292   : > { %1086 = vmax.xlane.f32.xlu0 %v1085_v59  ;;  %v1081_v60 = vpop.f32.mrb[6].mxu1 }
 0x293   : > { %v2037_v61 = vpop.f32.mrb[7].mxu1 }
 0x2a8   : > { %1148 = vrot.lane.b32.xlu0 %v1033_v41, %s2616_s25  ;;  %v1027_v41 = vadd.f32 %v1026_v1, %v421_v39  ;;  %v2343_v39 = vld [vmem:[#allocation8 + $0x64] ss:$8 sps:$4 sm:$0xff]  }
 0x2aa   : > { %v1036_v42 = vpack.c.bf16 %v1027_v41, %v1027_v41  ;;  %v2346_v41 = vld [vmem:[#allocation8 + $0x74] ss:$8 sps:$4 sm:$0xff]  }
 0x2ac   : > { %1208 = vrot.lane.b32.xlu0 %v1035_v7, %s2616_s25  ;;  %v1318_v45 = vsel %vm1099_vm3, %v1036_v42, 0 }
 0x31f   : > { %v1087_v8 = vpop.xlane.xlu0 %1086 }
 0x320   : > { %v1088_v9 = vsub.f32 %v1078_v57, %v1087_v8 }
 0x322   : > { %v1089_v10 = vmul.f32 1.442695, %v1088_v9 }
 0x323   : > { %v1149_v12 = vpop.permute.xlu0 %1148 }
 0x324   : > { %2371 = vpow2.f32 %v1089_v10  ;;  %v1154_v14 = vsel %vm1037_vm1, %v1149_v12, 0 }
 0x327   : > { %v1209_v15 = vpop.permute.xlu0 %1208 }
 0x328   : > { %v1214_v16 = vsel %vm1099_vm3, %v1209_v15, 0 }
 0x32e   : > { %v2917_v11 = vpop.eup %2371 }
 0x32f   : > { %v1095_v13 = vpack.c.bf16 %v2917_v11, %v2917_v11 }
 0x331   : > { %2041 = vmatmul.mubr.msk.bf16.vlgmr.msra.gmra.mrb[8].mxu1 %vm1084_vm2, %v1095_v13 }
 0x332   : > { %2045 = vmatpush3.bf16.xpose.msra.mxu1 %v1154_v14  ;;  %2046 = vmatprep.mubr.msk.bf16.mxu1 %vm2615_vm0, %v2614_v4 }
 0x333   : > { %2050 = vmatprep.subr.bf16.mxu1 %v2614_v4 }
 0x339   : > { %2047 = vmatmul.mubr.msk.bf16.vlgmr.msra.gmra.mrb[12].mxu1 %vm1037_vm1, %v1146_v17 }
 0x33a   : > { %2051 = vmatpush3.bf16.msra.mxu1 %v1214_v16  ;;  %2052 = vmatprep.mubr.msk.bf16.mxu1 %vm2615_vm0, %v2614_v4 }
 0x33b   : > { %2056 = vmatprep.subr.bf16.mxu1 %v2614_v4 }
 0x404   : > { %v2931_v18 = vpop.f32.mrb[8].mxu1 }
 0x405   : > { %v2042_v19 = vpop.f32.mrb[9].mxu1 }
 0x406   : > { %v1140_v20 = vpop.f32.mrb[10].mxu1 }
 0x407   : > { %v2043_v21 = vpop.f32.mrb[11].mxu1 }
 0x40c   : > { %v1190_v22 = vpop.f32.mrb[12].mxu1 }
 0x40d   : > { %v2048_v23 = vpop.f32.mrb[13].mxu1  ;;  %v1196_v25 = vsel %vm1084_vm2, %v1190_v22, -inf }
 0x40e   : > { %1197 = vmax.xlane.f32.xlu1 %v1196_v25  ;;  %v1193_v27 = vpop.f32.mrb[14].mxu1  ;;  %v2323_v23 = vld [vmem:[#allocation8] ss:$8 sps:$4 sm:$0xff]   ;;  %v2325_v25 = vld [vmem:[#allocation8 + $0x4] ss:$8 sps:$4 sm:$0xff]  }
 0x40f   : > { %v2049_v28 = vpop.f32.mrb[15].mxu1  ;;  %v2328_v27 = vld [vmem:[#allocation8 + $0x14] ss:$8 sps:$4 sm:$0xff]   ;;  %1690 = vmatprep.subr.bf16.mxu0 %v2325_v25 }
 0x410   : > { %1691 = vmatpush1.bf16.msra.mxu0 %v2323_v23  ;;  %v2326_v28 = vld [vmem:[#allocation8 + $0x10] ss:$8 sps:$4 sm:$0xff]  }
 0x411   : > { %1692 = vmatprep.subr.bf16.mxu0 %v2328_v27 }
 0x414   : > { %1693 = vmatpush1.bf16.msra.mxu0 %v2326_v28 }
 0x415   : > { %1694 = vmatprep.subr.bf16.mxu0 %v2331_v29 }
 0x418   : > { %1695 = vmatpush1.bf16.msra.mxu0 %v2329_v31 }
 0x419   : > { %1696 = vmatprep.subr.bf16.mxu0 %v2334_v33 }
 0x41c   : > { %1697 = vmatpush1.bf16.msra.mxu0 %v2332_v34 }
 0x41d   : > { %1698 = vmatprep.subr.bf16.mxu0 %v2337_v35 }
 0x41f   : > { %1365 = vrot.lane.b32.xlu1 %v1034_v36, %s2616_s25  ;;  %v2335_v36 = vld [vmem:[#allocation8 + $0x40] ss:$8 sps:$4 sm:$0xff]  }
 0x420   : > { %1699 = vmatpush1.bf16.msra.mxu0 %v2335_v36 }
 0x423   : > { %1362 = vrot.lane.b32.xlu1 %v1032_v40, %s2616_s25 }
 0x427   : > { %1425 = vrot.lane.b32.xlu1 %v1036_v42, %s2616_s25  ;;  %v2344_v42 = vld [vmem:[#allocation8 + $0x70] ss:$8 sps:$4 sm:$0xff]  }
 0x49b   : > { %v1198_v37 = vpop.xlane.xlu1 %1197 }
 0x49c   : > { %v1199_v43 = vsub.f32 %v1190_v22, %v1198_v37  ;;  %v1091_v22 = vsel %vm1084_vm2, %v2917_v11, 0.0  ;;  %v2340_v11 = vld [vmem:[#allocation8 + $0x54] ss:$8 sps:$4 sm:$0xff]   ;;  %v2349_v37 = vld [vmem:[#allocation8 + $0x84] ss:$8 sps:$4 sm:$0xff]  }
 0x49d   : > { %1700 = vmatprep.subr.bf16.mxu0 %v2340_v11 }
 0x49e   : > { %v1200_v44 = vmul.f32 1.442695, %v1199_v43  ;;  %1701 = vmatpush1.bf16.msra.mxu0 %v2338_v38  ;;  %v2347_v43 = vld [vmem:[#allocation8 + $0x80] ss:$8 sps:$4 sm:$0xff]  }
 0x49f   : > { %v1366_v61 = vpop.permute.xlu1 %1365  ;;  %1702 = vmatprep.subr.bf16.mxu0 %v2343_v39 }
 0x4a0   : > { %2373 = vpow2.f32 %v1200_v44  ;;  %v1371_v1 = vsel %vm1037_vm1, %v1366_v61, 0  ;;  %v2352_v44 = vld [vmem:[#allocation8 + $0x94] ss:$8 sps:$4 sm:$0xff]  }
 0x4a3   : > { %v1363_v0 = vpop.permute.xlu1 %1362 }
 0x4a7   : > { %v1426_v2 = vpop.permute.xlu1 %1425 }
 0x4a8   : > { %v1431_v5 = vsel %vm1099_vm3, %v1426_v2, 0 }
 0x4aa   : > { %v2374_v46 = vpop.eup %2373 }
 0x4ab   : > { %v1202_v47 = vsel %vm1084_vm2, %v2374_v46, 0.0  ;;  %v1206_v48 = vpack.c.bf16 %v2374_v46, %v2374_v46  ;;  %v2350_v46 = vld [vmem:[#allocation8 + $0x90] ss:$8 sps:$4 sm:$0xff]  }
 0x4ac   : > { %1203 = vadd.xlane.f32.xlu1 %v1202_v47  ;;  %v2355_v47 = vld [vmem:[#allocation8 + $0xa4] ss:$8 sps:$4 sm:$0xff]  }
 0x4ad   : > { %2053 = vmatmul.mubr.msk.bf16.vlgmr.msra.gmra.mrb[16].mxu1 %vm1084_vm2, %v1206_v48  ;;  %v2353_v48 = vld [vmem:[#allocation8 + $0xa0] ss:$8 sps:$4 sm:$0xff]  }
 0x4ae   : > { %2057 = vmatpush3.bf16.xpose.msra.mxu1 %v1261_v26  ;;  %2058 = vmatprep.mubr.msk.bf16.mxu1 %vm2615_vm0, %v2614_v4  ;;  %v2358_v26 = vld [vmem:[#allocation8 + $0xb4] ss:$8 sps:$4 sm:$0xff]  }
 0x4af   : > { %2062 = vmatprep.subr.bf16.mxu1 %v2614_v4 }
 0x4b5   : > { %2059 = vmatmul.mubr.msk.bf16.vlgmr.msra.gmra.mrb[20].mxu1 %vm1037_vm1, %v1032_v40  ;;  %v2341_v40 = vld [vmem:[#allocation8 + $0x60] ss:$8 sps:$4 sm:$0xff]  }
 0x4b6   : > { %2063 = vmatpush3.bf16.msra.mxu1 %v1318_v45  ;;  %2064 = vmatprep.mubr.msk.bf16.mxu1 %vm2615_vm0, %v2614_v4  ;;  %v2356_v45 = vld [vmem:[#allocation8 + $0xb0] ss:$8 sps:$4 sm:$0xff]  }
 0x4b7   : > { %2068 = vmatprep.subr.bf16.mxu1 %v2614_v4  ;;  %1703 = vmatpush1.bf16.msra.mxu0 %v2341_v40 }
 0x4b8   : > { %1704 = vmatprep.subr.bf16.mxu0 %v2346_v41 }
 0x4bb   : > { %1705 = vmatpush1.bf16.msra.mxu0 %v2344_v42 }
 0x4bc   : > { %1706 = vmatprep.subr.bf16.mxu0 %v2349_v37 }
 0x4bf   : > { %1707 = vmatpush1.bf16.msra.mxu0 %v2347_v43 }
 0x4c0   : > { %1708 = vmatprep.subr.bf16.mxu0 %v2352_v44 }
 0x4c3   : > { %1709 = vmatpush1.bf16.msra.mxu0 %v2350_v46 }
 0x4c4   : > { %1710 = vmatprep.subr.bf16.mxu0 %v2355_v47 }
 0x4c7   : > { %1711 = vmatpush1.bf16.msra.mxu0 %v2353_v48 }
 0x4c8   : > { %1712 = vmatprep.subr.bf16.mxu0 %v2358_v26 }
 0x4cb   : > { %1713 = vmatpush1.bf16.msra.mxu0 %v2356_v45 }
 0x580   : > { %v2958_v49 = vpop.f32.mrb[16].mxu1 }
 0x581   : > { %v2054_v50 = vpop.f32.mrb[17].mxu1 }
 0x582   : > { %v1253_v51 = vpop.f32.mrb[18].mxu1  ;;  %v2361_v50 = vld [vmem:[#allocation8 + $0xc4] ss:$8 sps:$4 sm:$0xff]  }
 0x583   : > { %v2055_v52 = vpop.f32.mrb[19].mxu1  ;;  %v2359_v51 = vld [vmem:[#allocation8 + $0xc0] ss:$8 sps:$4 sm:$0xff]   ;;  %1714 = vmatprep.subr.bf16.mxu0 %v2361_v50 }
 0x584   : > { %v2364_v52 = vld [vmem:[#allocation8 + $0xd4] ss:$8 sps:$4 sm:$0xff]   ;;  %1715 = vmatpush1.bf16.msra.mxu0 %v2359_v51 }
 0x585   : > { %1716 = vmatprep.subr.bf16.mxu0 %v2364_v52 }
 0x588   : > { %v1297_v53 = vpop.f32.mrb[20].mxu1 }
 0x589   : > { %v2060_v54 = vpop.f32.mrb[21].mxu1  ;;  %v1303_v55 = vsel %vm1084_vm2, %v1297_v53, -inf }
 0x58a   : > { %1304 = vmax.xlane.f32.xlu0 %v1303_v55  ;;  %v1300_v56 = vpop.f32.mrb[22].mxu1  ;;  %v2367_v54 = vld [vmem:[#allocation8 + $0xe4] ss:$8 sps:$4 sm:$0xff]   ;;  %v2365_v55 = vld [vmem:[#allocation8 + $0xe0] ss:$8 sps:$4 sm:$0xff]  }
 0x58b   : > { %v2061_v57 = vpop.f32.mrb[23].mxu1  ;;  %v1204_v56 = vpop.xlane.xlu1 %1203 }
 0x617   : > { %v1305_v58 = vpop.xlane.xlu0 %1304 }
 0x618   : > { %v1306_v59 = vsub.f32 %v1297_v53, %v1305_v58  ;;  %v2362_v53 = vld [vmem:[#allocation8 + $0xd0] ss:$8 sps:$4 sm:$0xff]   ;;  %v2370_v58 = vld [vmem:[#allocation8 + $0xf4] ss:$8 sps:$4 sm:$0xff]  }
 0x619   : > { %1717 = vmatpush1.bf16.msra.mxu0 %v2362_v53 }
 0x61a   : > { %v1307_v60 = vmul.f32 1.442695, %v1306_v59  ;;  %1718 = vmatprep.subr.bf16.mxu0 %v2367_v54  ;;  %v2368_v59 = vld [vmem:[#allocation8 + $0xf0] ss:$8 sps:$4 sm:$0xff]  }
 0x61c   : > { %2375 = vpow2.f32 %v1307_v60 }
 0x61d   : > { %1719 = vmatpush1.bf16.msra.mxu0 %v2365_v55 }
 0x61e   : > { %1720 = vmatprep.subr.bf16.mxu0 %v2370_v58 }
 0x621   : > { %1721 = vmatpush1.bf16.msra.mxu0 %v2368_v59 }
 0x626   : > { %v2376_v62 = vpop.eup %2375 }
 0x627   : > { %v1313_v63 = vpack.c.bf16 %v2376_v62, %v2376_v62  ;;  %v1309_v21 = vsel %vm1084_vm2, %v2376_v62, 0.0 }
 0x629   : > { %2065 = vmatmul.mubr.msk.bf16.vlgmr.msra.gmra.mrb[24].mxu1 %vm1084_vm2, %v1313_v63 }
 0x62a   : > { %2069 = vmatpush3.bf16.xpose.msra.mxu1 %v1371_v1  ;;  %2070 = vmatprep.mubr.msk.bf16.mxu1 %vm2615_vm0, %v2614_v4 }
 0x62b   : > { %2074 = vmatprep.subr.bf16.mxu1 %v2614_v4 }
 0x631   : > { %2071 = vmatmul.mubr.msk.bf16.vlgmr.msra.gmra.mrb[28].mxu1 %vm1037_vm1, %v1363_v0 }
 0x632   : > { %2075 = vmatpush3.bf16.msra.mxu1 %v1431_v5  ;;  %2076 = vmatprep.mubr.msk.bf16.mxu1 %vm2615_vm0, %v2614_v4 }
 0x6fc   : > { %v2970_v6 = vpop.f32.mrb[24].mxu1 }
 0x6fd   : > { %v2066_v7 = vpop.f32.mrb[25].mxu1 }
 0x6fe   : > { %v1357_v3 = vpop.f32.mrb[26].mxu1 }
 0x6ff   : > { %v2067_v8 = vpop.f32.mrb[27].mxu1 }
 0x704   : > { %v1407_v9 = vpop.f32.mrb[28].mxu1 }
 0x705   : > { %v2072_v10 = vpop.f32.mrb[29].mxu1  ;;  %v1413_v12 = vsel %vm1084_vm2, %v1407_v9, -inf }
 0x706   : > { %1414 = vmax.xlane.f32.xlu0 %v1413_v12  ;;  %v1410_v13 = vpop.f32.mrb[30].mxu1 }
 0x707   : > { %v2073_v14 = vpop.f32.mrb[31].mxu1 }
 0x793   : > { %v1415_v15 = vpop.xlane.xlu0 %1414 }
 0x794   : > { %v1416_v16 = vsub.f32 %v1407_v9, %v1415_v15 }
 0x796   : > { %v1417_v17 = vmul.f32 1.442695, %v1416_v16 }
 0x798   : > { %2377 = vpow2.f32 %v1417_v17 }
 0x799   : > { %2379 = vrcp.f32 %v1204_v56 }
 0x7a2   : > { %v2378_v19 = vpop.eup %2377 }
 0x7a3   : > { %v1419_v20 = vsel %vm1084_vm2, %v2378_v19, 0.0  ;;  %v1423_v4 = vpack.c.bf16 %v2378_v19, %v2378_v19  ;;  %v2380_v60 = vpop.eup %2379 }
 0x7a4   : > { %1420 = vadd.xlane.f32.xlu0 %v1419_v20  ;;  %v1256_v63 = vmul.f32 %v2380_v60, %v2958_v49 }
 0x7a5   : > { %2077 = vmatmul.mubr.msk.bf16.vlgmr.msra.gmra.mrb[32].mxu1 %vm1084_vm2, %v1423_v4  ;;  %v1518_v4 = vld [vmem:[#allocation10] sm:$0x3] }
 0x7a8   : > { %1310 = vadd.xlane.f32.xlu0 %v1309_v21  ;;  %v1523_v21 = vrot.slane %v1518_v4, %v400_v30 }
 0x7ac   : > { %1092 = vadd.xlane.f32.xlu0 %v1091_v22 }
 0x831   : > { %v1421_v57 = vpop.xlane.xlu0 %1420 }
 0x832   : > { %2381 = vrcp.f32 %v1421_v57 }
 0x835   : > { %v1311_v3 = vpop.xlane.xlu0 %1310 }
 0x836   : > { %2383 = vrcp.f32 %v1311_v3 }
 0x839   : > { %v1093_v8 = vpop.xlane.xlu0 %1092 }
 0x83a   : > { %2385 = vrcp.f32 %v1093_v8 }
 0x83c   : > { %v2382_v61 = vpop.eup %2381 }
 0x840   : > { %v2384_v9 = vpop.eup %2383 }
 0x841   : > { %v1360_v15 = vmul.f32 %v2384_v9, %v2970_v6 }
 0x844   : > { %v2386_v10 = vpop.eup %2385 }
 0x845   : > { %v1143_v13 = vmul.f32 %v2386_v10, %v2931_v18  ;;  %v1527_v18 = vrot.slane %v1518_v4, %v404_v32 }
 0x878   : > { %v1467_v62 = vpop.f32.mrb[32].mxu1 }
 0x879   : > { %v1473_v0 = vmul.f32 %v2382_v61, %v1467_v62  ;;  %v2078_v1 = vpop.f32.mrb[33].mxu1 }
 0x87a   : > { %v1470_v2 = vpop.f32.mrb[34].mxu1 }
 0x87b   : > { %v2174_v5 = vpack.i.bf16 %v1256_v63, %v1473_v0  ;;  %v2079_v7 = vpop.f32.mrb[35].mxu1 }
 0x87d   : > { %2175 = vrot.lane.b32.xlu0 %v2174_v5, %s2616_s25 }
 0x8ef   : > { %v2176_v12 = vpop.permute.xlu0 %2175 }
 0x8f0   : > { %v2178_v14 = vunpack.i.h.bf16 %v2176_v12  ;;  %v2177_v49 = vunpack.i.l.bf16 %v2176_v12 }
 0x8f2   : > { %v1482_v16 = vsel %vm1037_vm1, %v1143_v13, %v2178_v14  ;;  %v1483_v17 = vsel %vm1037_vm1, %v1360_v15, %v2177_v49 }
 0x8f3   : > { %v1484_v19 = vpack.c.bf16 %v1482_v16, %v1482_v16  ;;  %v1485_v20 = vpack.c.bf16 %v1483_v17, %v1483_v17 }
 0x8f5   : > { %1722 = vmatprep.mubr.bf16.mxu0 %v1485_v20 }
 0x8f6   : > { %1723 = vmatmul.mubr.bf16.vlgmr.msra.gmra.mrb[8].mxu0 %v1484_v19 }
 0x9c9   : > { %v1724_v6 = vpop.f32.mrb[8].mxu0 }
 0x9ca   : > { %v1725_v22 = vadd.f32 %v1724_v6, %v1523_v21  ;;  %v1726_v23 = vpop.f32.mrb[9].mxu0 }
 0x9cb   : > { %v1727_v25 = vadd.f32 %v1726_v23, %v1527_v18  ;;  %v1728_v27 = vpop.f32.mrb[10].mxu0 }
 0x9cc   : > { %1731 = vst [vmem:[%s294_s17] sm:$0xff] %v1725_v22  ;;  %v1729_v24 = vpop.f32.mrb[11].mxu0 }
 0x9cd   : > { %1732 = vst [vmem:[%s294_s17 + $0x8] sm:$0xff] %v1727_v25 }
 0x9ce   : > { %2542 = shalt.err (!%p2539_p12)
}
 0x9cf   : > { %s2543_s22 = scalar_lea.hbm %s2994_s27, 256  ;;  %s2547_s7 = scalar_lea.hbm %s3043_s5, 512 }
 0x9d0   : > { %p2544_p13 = scmp.ne.s32.totalorder %s2994_s27, %s2543_s22  ;;  %p2548_p9 = scmp.lt.u32.totalorder %s2994_s27, %s3043_s5 }
 0x9d1   : > { %p2549_p4 = scmp.lt.u32.totalorder %s2547_s7, %s2543_s22  ;;  %p2551_p6 = scmp.lt.u32.totalorder %s2543_s22, %s2994_s27 }
 0x9d2   : > { %p2545_p1 = pnand %p2544_p13, %p3061_p0 }
 0x9d3   : > { %p2550_p8 = por %p2549_p4, %p2548_p9 }
 0x9d4   : > { %p2546_p7 = pneg %p2545_p1 }
 0x9d5   : > { %p2552_p2 = por %p2551_p6, %p2550_p8 }
 0x9d7   : > { %p2553_p5 = pnand %p2552_p2, %p2546_p7 }
 0x9d9   : > { %2556 = shalt.err (!%p2553_p5)
}
 0x9da   : > { %2098 = dma.vmem_to_hbm [thread:$0]  (%p3061_p0), %s2996_s30, 256, %s2994_s27, %s1734_s24  }
 0x9db PF: > { %s1760_s9 = sand.u32 1, %s2591_s18   ;;  %p3062_p10 = scmp.ne.s32.totalorder %s3054_s12, 0 }
 0x9dc   : > { %p3063_p11 = scmp.ge.s32.totalorder %s2603_s21, 2  ;;  %s1761_s17 = scalar_lea.sflag [#allocation4], %s1760_s9 }
 0x9de   : > { %p2118_p3 = pnand %p3063_p11, %p3062_p10 }
 0x9e0   : > { %2586 = dma.done.wait (!%p2118_p3), %s1761_s17, 256  }
 0x9e1   : > { %2588 = vsyncadd (!%p2118_p3), %s1761_s17, 4294967040  ;;  %p20_p12 = scmp.ge.s32.totalorder %s2784_s28, 4   ;;  %s3064_s18 = smov %s2595_s19 }
 0x9e2   : > { %s3065_s19 = smov %s2599_s20  ;;  %s3066_s20 = smov %s2795_s8 }
 0x9e3   : > { %s3067_s21 = smov %s2784_s28  ;;  %22 = sbr.rel (!%p20_p12) target bundleno = 7 (0x7), region = 101 }
 0x9ea   :  { %1766 = vsyncpa [#allocation3], 1 }
 0x9eb   :  { %1768 = vsyncpa [#allocation3 + $0x1], 1 }
 0x9ec   :  { %1769 = vsyncpa [#allocation6], 1 }
 0x9ed   :  { %1770 = vsyncpa [#allocation9], 1 }
 0x9ee   :  { %1771 = vsyncpa [#allocation4], 1 }
 0x9ef   :  { %1773 = vsyncpa [#allocation4 + $0x1], 1 }

</bundles_post_ra>
